<compile_context>
chip_gen: v5e
topology: v5e:2x2
jax: 0.10.0
libtpu: 0.0.40
codegen_flags: <defaults>
</compile_context>

<pallas_src>
import functools

import jax
import jax.numpy as jnp
import numpy as np
from jax import lax
from jax.experimental import pallas as pl
from jax.experimental.pallas import tpu as pltpu

NEG_INF = -1e30


# ----------------------------------------------------------------------------
# Fused decoder kernel: one grid step = one layer applied to one batch block.
# Grid = (num_batch_blocks, n_layer); layer axis innermost and "arbitrary".
# The OUTPUT block (same block index for every layer) is the VMEM-resident
# activation carry; HBM writeback only happens when the batch-block changes.
# ----------------------------------------------------------------------------
def _decoder_kernel(x_ref, wqkv_ref, bqkv_ref, wo_ref, bo_ref,
                    ln1w_ref, ln1b_ref, w1_ref, b1_ref, w2_ref, b2_ref,
                    ln2w_ref, ln2b_ref, o_ref, attn_ref,
                    *, n_head, seq_len, block_b):
    l = pl.program_id(1)

    # Seed the resident carry (the output block itself) from the input at layer 0.
    @pl.when(l == 0)
    def _():
        o_ref[...] = x_ref[...]

    x = o_ref[...]                          # (M, D) fp32, resident across layers
    M, D = x.shape
    S = seq_len
    H = n_head
    dh = D // H

    xb = x.astype(jnp.bfloat16)

    # --- QKV projection (1/sqrt(dh) already folded into Q weight/bias) -------
    qkv = jnp.dot(xb, wqkv_ref[0],
                  preferred_element_type=jnp.float32) + bqkv_ref[0]   # (M, 3D)

    # causal mask shared by all heads / batch elements
    row = lax.broadcasted_iota(jnp.int32, (S, S), 0)
    col = lax.broadcasted_iota(jnp.int32, (S, S), 1)
    causal = (col > row)[None, :, :]        # (1, S, S)

    # --- attention: per-head static lane slices, batched over the batch block.
    # No XLU transposes, no concatenate: reshapes below only split/merge the
    # leading (row) dimension, and head outputs land in their lane slice of the
    # attn_ref scratch so the out-projection is one dense matmul.
    for h in range(H):
        q_h = qkv[:, h * dh:(h + 1) * dh].reshape(block_b, S, dh)
        k_h = qkv[:, D + h * dh:D + (h + 1) * dh].reshape(block_b, S, dh)
        v_h = qkv[:, 2 * D + h * dh:2 * D + (h + 1) * dh].reshape(block_b, S, dh)

        s = jnp.einsum('bqd,bkd->bqk',
                       q_h.astype(jnp.bfloat16), k_h.astype(jnp.bfloat16),
                       preferred_element_type=jnp.float32)            # (b, S, S)
        s = jnp.where(causal, NEG_INF, s)
        m = jnp.max(s, axis=-1, keepdims=True)
        p = jnp.exp(s - m)
        denom = jnp.sum(p, axis=-1, keepdims=True)
        p = p * pl.reciprocal(denom, approx=True)

        o_h = jnp.einsum('bqk,bkd->bqd',
                         p.astype(jnp.bfloat16), v_h.astype(jnp.bfloat16),
                         preferred_element_type=jnp.float32)          # (b, S, dh)
        attn_ref[:, h * dh:(h + 1) * dh] = o_h.reshape(M, dh)

    # out projection: single dense (M, D) @ (D, D)
    attn = jnp.dot(attn_ref[...].astype(jnp.bfloat16), wo_ref[0],
                   preferred_element_type=jnp.float32) + bo_ref[0]

    # --- residual + LayerNorm 1 (fp32 statistics) -----------------------------
    h1 = x + attn
    mu = jnp.mean(h1, axis=-1, keepdims=True)
    var = jnp.mean((h1 - mu) ** 2, axis=-1, keepdims=True)
    h1 = (h1 - mu) * lax.rsqrt(var + 1e-5) * ln1w_ref[0] + ln1b_ref[0]

    # --- feed-forward (relu) --------------------------------------------------
    ff = jnp.dot(h1.astype(jnp.bfloat16), w1_ref[0],
                 preferred_element_type=jnp.float32) + b1_ref[0]
    ff = jnp.maximum(ff, 0.0)
    ff = jnp.dot(ff.astype(jnp.bfloat16), w2_ref[0],
                 preferred_element_type=jnp.float32) + b2_ref[0]

    # --- residual + LayerNorm 2 -----------------------------------------------
    h2 = h1 + ff
    mu2 = jnp.mean(h2, axis=-1, keepdims=True)
    var2 = jnp.mean((h2 - mu2) ** 2, axis=-1, keepdims=True)
    h2 = (h2 - mu2) * lax.rsqrt(var2 + 1e-5) * ln2w_ref[0] + ln2b_ref[0]

    # carry to next layer; only the final (last-layer) value reaches HBM
    o_ref[...] = h2


# ----------------------------------------------------------------------------
# Block sizing / VMEM budgeting
# ----------------------------------------------------------------------------
def _choose_block_b(B, S, D, d_ff, vmem_budget_bytes=48 << 20):
    """Pick rows-per-step M = block_b*S as large as the VMEM budget allows.

    Weight HBM traffic is nb * n_layer * weight_bytes, so larger M both hides
    the per-layer weight DMA behind compute and cuts total traffic by nb x.
    (Compute-bound crossover: ~256 rows on v5e, ~650-768 on v6e, ~320-512 on
    v7x.)  Only split to an even number of batch blocks — so both v7x
    TensorCores get work on the "parallel" axis — when each half keeps >= 512
    rows; on v5e/v6e a split just doubles weight traffic.
    The 48 MiB default budget is sized for v7x's 64 MiB VMEM; raise it (and the
    resulting vmem_limit) toward ~100 MiB on v5e/v6e for very large models.
    """
    # double-buffered bf16 per-layer weight set
    wbytes = 2 * 2 * (D * 3 * D + D * D + 2 * D * d_ff)
    # fp32 live activation bytes per row (in/out blocks, qkv, attn scratch,
    # h1/h2 temporaries, ff hidden)
    act_bytes_per_row = 4 * (8 * D + 3 * D + d_ff)
    avail = max(vmem_budget_bytes - wbytes, 2 << 20)

    block_b = 1
    for d in range(1, B + 1):                 # keep the largest divisor that fits
        if B % d:
            continue
        if d * S * act_bytes_per_row + 3 * d * S * S * 4 <= avail:
            block_b = d
    # v7x megacore: prefer >= 2 batch blocks if each keeps a compute-bound M.
    if B // block_b == 1 and B % 2 == 0 and (B // 2) * S >= 512:
        block_b = B // 2
    return block_b


def _vmem_limit_bytes(M, D, d_ff, block_b, S):
    wbytes = 2 * 2 * (D * 3 * D + D * D + 2 * D * d_ff)      # double-buffered bf16
    abytes = 4 * M * (8 * D + 3 * D + d_ff) + 3 * block_b * S * S * 4
    est = wbytes + abytes
    return int(min(128 << 20, max(32 << 20, int(1.5 * est))))


# ----------------------------------------------------------------------------
# Wrapper: stacked-weight, fused-layer pallas_call
# ----------------------------------------------------------------------------
def transformer_decoder_pallas(x, prep, n_head, block_b=None,
                               vmem_limit_bytes=None):
    """x: (B, S, D) fp32. prep: dict of layer-stacked weights (see prepare_params)."""
    B, S, D = x.shape
    L = prep['wqkv'].shape[0]
    d_ff = prep['w1'].shape[-1]

    if block_b is None:
        block_b = _choose_block_b(B, S, D, d_ff)
    assert B % block_b == 0
    M = block_b * S
    assert M % 8 == 0, "block rows (block_b * S) must be a multiple of 8 sublanes"
    nb = B // block_b

    if vmem_limit_bytes is None:
        vmem_limit_bytes = _vmem_limit_bytes(M, D, d_ff, block_b, S)

    x2 = x.reshape(B * S, D)

    # NOTE: the x block index only changes once every L grid steps; when VMEM is
    # tight (v7x) it can additionally be single-buffered via
    # pipeline_mode=pl.Buffered(1).
    x_spec = pl.BlockSpec((M, D), lambda bi, l: (bi, 0))

    def wspec(a):
        nd = a.ndim
        return pl.BlockSpec((1,) + a.shape[1:],
                            lambda bi, l, _nd=nd: (l,) + (0,) * (_nd - 1))

    weights = [prep['wqkv'], prep['bqkv'], prep['wo'], prep['bo'],
               prep['ln1w'], prep['ln1b'],
               prep['w1'], prep['b1'], prep['w2'], prep['b2'],
               prep['ln2w'], prep['ln2b']]

    kernel = functools.partial(_decoder_kernel, n_head=n_head, seq_len=S,
                               block_b=block_b)

    out2 = pl.pallas_call(
        kernel,
        out_shape=jax.ShapeDtypeStruct((B * S, D), jnp.float32),
        grid=(nb, L),
        in_specs=[x_spec] + [wspec(w) for w in weights],
        out_specs=pl.BlockSpec((M, D), lambda bi, l: (bi, 0)),
        scratch_shapes=[pltpu.VMEM((M, D), jnp.float32)],   # per-head attn assembly
        compiler_params=pltpu.CompilerParams(
            dimension_semantics=("parallel", "arbitrary"),
            vmem_limit_bytes=vmem_limit_bytes),
    )(x2, *weights)
    return out2.reshape(B, S, D)


# ----------------------------------------------------------------------------
# Parameter construction / preparation
# ----------------------------------------------------------------------------
def make_raw_params(key, n_layer, d_model, d_ff):
    """fp32 weights already transposed to [in, out] (as nn.Linear.weight.T)."""
    layers = []
    for l in range(n_layer):
        ks = jax.random.split(jax.random.fold_in(key, l), 8)
        layers.append(dict(
            wqkv=jax.random.normal(ks[0], (d_model, 3 * d_model), jnp.float32) * 0.05,
            bqkv=jax.random.normal(ks[1], (3 * d_model,), jnp.float32) * 0.02,
            wo=jax.random.normal(ks[2], (d_model, d_model), jnp.float32) * 0.05,
            bo=jax.random.normal(ks[3], (d_model,), jnp.float32) * 0.02,
            ln1w=jnp.ones((d_model,), jnp.float32),
            ln1b=jnp.zeros((d_model,), jnp.float32),
            w1=jax.random.normal(ks[4], (d_model, d_ff), jnp.float32) * 0.05,
            b1=jax.random.normal(ks[5], (d_ff,), jnp.float32) * 0.02,
            w2=jax.random.normal(ks[6], (d_ff, d_model), jnp.float32) * 0.05,
            b2=jax.random.normal(ks[7], (d_model,), jnp.float32) * 0.02,
            ln2w=jnp.ones((d_model,), jnp.float32),
            ln2b=jnp.zeros((d_model,), jnp.float32),
        ))
    return layers


def prepare_params(raw_layers, n_head):
    """Stack per-layer params on a leading layer axis, fold the 1/sqrt(dh)
    attention scale into the Q projection (weight AND bias), cast matmul
    weights to bf16 (biases / LN params stay fp32)."""
    d_model = raw_layers[0]['wqkv'].shape[0]
    dh = d_model // n_head
    scale = 1.0 / float(np.sqrt(dh))

    def stack(name):
        return jnp.stack([p[name] for p in raw_layers], axis=0)

    wqkv = stack('wqkv')                                  # (L, D, 3D)
    bqkv = stack('bqkv')                                  # (L, 3D)
    wqkv = wqkv.at[:, :, :d_model].multiply(scale)
    bqkv = bqkv.at[:, :d_model].multiply(scale)

    bf16 = jnp.bfloat16
    return dict(
        wqkv=wqkv.astype(bf16),
        bqkv=bqkv[:, None, :],
        wo=stack('wo').astype(bf16),
        bo=stack('bo')[:, None, :],
        ln1w=stack('ln1w')[:, None, :],
        ln1b=stack('ln1b')[:, None, :],
        w1=stack('w1').astype(bf16),
        b1=stack('b1')[:, None, :],
        w2=stack('w2').astype(bf16),
        b2=stack('b2')[:, None, :],
        ln2w=stack('ln2w')[:, None, :],
        ln2b=stack('ln2b')[:, None, :],
    )


# ----------------------------------------------------------------------------
# Pure-JAX reference (same bf16-operand / fp32-accumulate math, exact softmax)
# ----------------------------------------------------------------------------
def _ref_decoder(x, prep, n_head):
    B, S, D = x.shape
    L = prep['wqkv'].shape[0]
    H = n_head
    dh = D // H
    bf16, f32 = jnp.bfloat16, jnp.float32

    mask = jnp.arange(S)[None, :] > jnp.arange(S)[:, None]

    out = x
    for l in range(L):
        wqkv, bqkv = prep['wqkv'][l], prep['bqkv'][l]
        wo, bo = prep['wo'][l], prep['bo'][l]
        ln1w, ln1b = prep['ln1w'][l], prep['ln1b'][l]
        w1, b1 = prep['w1'][l], prep['b1'][l]
        w2, b2 = prep['w2'][l], prep['b2'][l]
        ln2w, ln2b = prep['ln2w'][l], prep['ln2b'][l]

        def one(xb):
            qkv = jnp.dot(xb.astype(bf16), wqkv, preferred_element_type=f32) + bqkv
            q = qkv[:, :D].reshape(S, H, dh).transpose(1, 0, 2)
            k = qkv[:, D:2 * D].reshape(S, H, dh).transpose(1, 0, 2)
            v = qkv[:, 2 * D:].reshape(S, H, dh).transpose(1, 0, 2)
            s = jnp.einsum('hqd,hkd->hqk', q.astype(bf16), k.astype(bf16),
                           preferred_element_type=f32)
            s = jnp.where(mask[None], NEG_INF, s)
            p_attn = jax.nn.softmax(s, axis=-1)
            o = jnp.einsum('hqk,hkd->hqd', p_attn.astype(bf16), v.astype(bf16),
                           preferred_element_type=f32)
            o = o.transpose(1, 0, 2).reshape(S, D)
            o = jnp.dot(o.astype(bf16), wo, preferred_element_type=f32) + bo
            h1 = xb + o
            mu = h1.mean(-1, keepdims=True)
            var = ((h1 - mu) ** 2).mean(-1, keepdims=True)
            h1 = (h1 - mu) / jnp.sqrt(var + 1e-5) * ln1w + ln1b
            ff = jnp.dot(h1.astype(bf16), w1, preferred_element_type=f32) + b1
            ff = jnp.maximum(ff, 0.0)
            ff = jnp.dot(ff.astype(bf16), w2, preferred_element_type=f32) + b2
            h2 = h1 + ff
            mu2 = h2.mean(-1, keepdims=True)
            var2 = ((h2 - mu2) ** 2).mean(-1, keepdims=True)
            return (h2 - mu2) / jnp.sqrt(var2 + 1e-5) * ln2w + ln2b

        out = jax.vmap(one)(out)
    return out


if __name__ == "__main__":
    # small shapes consistent with the module: n_layer=2, n_head=4,
    # d_model=32, d_ff=64, batch=2, seq=8
    n_layer, n_head, d_model, d_ff = 2, 4, 32, 64
    B, S = 2, 8

    key = jax.random.PRNGKey(0)
    kx, kp = jax.random.split(key)
    x = jax.random.normal(kx, (B, S, d_model), jnp.float32)
    raw = make_raw_params(kp, n_layer, d_model, d_ff)
    prep = prepare_params(raw, n_head)

    out = transformer_decoder_pallas(x, prep, n_head)
    out = jax.block_until_ready(out)

    ref = _ref_decoder(x, prep, n_head)
    np.testing.assert_allclose(np.asarray(out), np.asarray(ref),
                               rtol=2e-2, atol=2e-2)
    print("KERNEL_OK")
</pallas_src>

<mosaic_0001>
module attributes {stable_mosaic.version = 11 : i64} {
  func.func @_decoder_kernel(%arg0: i32, %arg1: i32, %arg2: memref<16x32xf32, #tpu.memory_space<vmem>>, %arg3: memref<1x32x96xbf16, #tpu.memory_space<vmem>>, %arg4: memref<1x1x96xf32, #tpu.memory_space<vmem>>, %arg5: memref<1x32x32xbf16, #tpu.memory_space<vmem>>, %arg6: memref<1x1x32xf32, #tpu.memory_space<vmem>>, %arg7: memref<1x1x32xf32, #tpu.memory_space<vmem>>, %arg8: memref<1x1x32xf32, #tpu.memory_space<vmem>>, %arg9: memref<1x32x64xbf16, #tpu.memory_space<vmem>>, %arg10: memref<1x1x64xf32, #tpu.memory_space<vmem>>, %arg11: memref<1x64x32xbf16, #tpu.memory_space<vmem>>, %arg12: memref<1x1x32xf32, #tpu.memory_space<vmem>>, %arg13: memref<1x1x32xf32, #tpu.memory_space<vmem>>, %arg14: memref<1x1x32xf32, #tpu.memory_space<vmem>>, %arg15: memref<16x32xf32, #tpu.memory_space<vmem>>, %arg16: memref<16x32xf32, #tpu.memory_space<vmem>>) attributes {dimension_semantics = [#tpu.dimension_semantics<parallel>, #tpu.dimension_semantics<arbitrary>], iteration_bounds = array<i64: 1, 2>, scalar_prefetch = 0 : i64, scratch_operands = 1 : i64, tpu.core_type = #tpu.core_type<tc>, window_params = [{transform_indices = @transform_0, window_bounds = array<i64: 16, 32>}, {transform_indices = @transform_1, window_bounds = array<i64: 1, 32, 96>}, {transform_indices = @transform_2, window_bounds = array<i64: 1, 1, 96>}, {transform_indices = @transform_3, window_bounds = array<i64: 1, 32, 32>}, {transform_indices = @transform_4, window_bounds = array<i64: 1, 1, 32>}, {transform_indices = @transform_5, window_bounds = array<i64: 1, 1, 32>}, {transform_indices = @transform_6, window_bounds = array<i64: 1, 1, 32>}, {transform_indices = @transform_7, window_bounds = array<i64: 1, 32, 64>}, {transform_indices = @transform_8, window_bounds = array<i64: 1, 1, 64>}, {transform_indices = @transform_9, window_bounds = array<i64: 1, 64, 32>}, {transform_indices = @transform_10, window_bounds = array<i64: 1, 1, 32>}, {transform_indices = @transform_11, window_bounds = array<i64: 1, 1, 32>}, {transform_indices = @transform_12, window_bounds = array<i64: 1, 1, 32>}, {transform_indices = @transform_13, window_bounds = array<i64: 16, 32>}]} {
    %c0_i32 = arith.constant 0 : i32
    %0 = arith.cmpi eq, %arg1, %c0_i32 : i32
    %1 = arith.extui %0 : i1 to i32
    %c0_i32_0 = arith.constant 0 : i32
    %2 = arith.cmpi ne, %1, %c0_i32_0 : i32
    scf.if %2 {
      %c0_81 = arith.constant 0 : index
      %c0_82 = arith.constant 0 : index
      %210 = vector.load %arg2[%c0_81, %c0_82] : memref<16x32xf32, #tpu.memory_space<vmem>>, vector<16x32xf32>
      %c0_83 = arith.constant 0 : index
      %c0_84 = arith.constant 0 : index
      %211 = vector.load %arg15[%c0_83, %c0_84] : memref<16x32xf32, #tpu.memory_space<vmem>>, vector<16x32xf32>
      tpu.vector_store %arg15[%c0_83, %c0_84], %210 {strides = array<i32>} : memref<16x32xf32, #tpu.memory_space<vmem>>, vector<16x32xf32>,
    } else {
    }
    %c0 = arith.constant 0 : index
    %c0_1 = arith.constant 0 : index
    %3 = vector.load %arg15[%c0, %c0_1] : memref<16x32xf32, #tpu.memory_space<vmem>>, vector<16x32xf32>
    %4 = arith.truncf %3 : vector<16x32xf32> to vector<16x32xbf16>
    %c0_2 = arith.constant 0 : index
    %c0_3 = arith.constant 0 : index
    %c0_4 = arith.constant 0 : index
    %5 = vector.load %arg3[%c0_2, %c0_3, %c0_4] : memref<1x32x96xbf16, #tpu.memory_space<vmem>>, vector<1x32x96xbf16>
    %6 = vector.shape_cast %5 : vector<1x32x96xbf16> to vector<32x96xbf16>
    %cst = arith.constant dense<0.000000e+00> : vector<16x96xf32>
    %7 = tpu.matmul %4, %6, %cst {dimension_numbers = #tpu.dot_dimension_numbers<[1], [0], [0], [1], [0, 0, 1, 1], [], []>} : vector<16x32xbf16>, vector<32x96xbf16>, vector<16x96xf32> -> vector<16x96xf32>
    %c0_5 = arith.constant 0 : index
    %c0_6 = arith.constant 0 : index
    %c0_7 = arith.constant 0 : index
    %8 = vector.load %arg4[%c0_5, %c0_6, %c0_7] : memref<1x1x96xf32, #tpu.memory_space<vmem>>, vector<1x1x96xf32>
    %9 = vector.shape_cast %8 : vector<1x1x96xf32> to vector<1x96xf32>
    %10 = vector.broadcast %9 : vector<1x96xf32> to vector<16x96xf32>
    %11 = arith.addf %7, %10 : vector<16x96xf32>
    %12 = tpu.iota {dimensions = array<i32: 0>} : vector<8x8xi32>
    %13 = tpu.iota {dimensions = array<i32: 1>} : vector<8x8xi32>
    %14 = arith.cmpi sgt, %13, %12 : vector<8x8xi32>
    %15 = vector.shape_cast %14 : vector<8x8xi1> to vector<1x8x8xi1>
    %16 = vector.extract_strided_slice %11 {offsets = [0, 0], sizes = [16, 8], strides = [1, 1]} : vector<16x96xf32> to vector<16x8xf32>
    %17 = vector.shape_cast %16 : vector<16x8xf32> to vector<2x8x8xf32>
    %18 = vector.extract_strided_slice %11 {offsets = [0, 32], sizes = [16, 8], strides = [1, 1]} : vector<16x96xf32> to vector<16x8xf32>
    %19 = vector.shape_cast %18 : vector<16x8xf32> to vector<2x8x8xf32>
    %20 = vector.extract_strided_slice %11 {offsets = [0, 64], sizes = [16, 8], strides = [1, 1]} : vector<16x96xf32> to vector<16x8xf32>
    %21 = vector.shape_cast %20 : vector<16x8xf32> to vector<2x8x8xf32>
    %22 = arith.truncf %17 : vector<2x8x8xf32> to vector<2x8x8xbf16>
    %23 = arith.truncf %19 : vector<2x8x8xf32> to vector<2x8x8xbf16>
    "tpu.trace_start"() <{level = 10 : i32, message = "bqd,bkd->bqk"}> : () -> ()
    %cst_8 = arith.constant dense<0.000000e+00> : vector<2x8x8xf32>
    %24 = tpu.matmul %22, %23, %cst_8 {dimension_numbers = #tpu.dot_dimension_numbers<[2], [2], [1], [1], [0, 0, 0, 1, 1, 1], [0], [0]>} : vector<2x8x8xbf16>, vector<2x8x8xbf16>, vector<2x8x8xf32> -> vector<2x8x8xf32>
    %cst_9 = arith.constant -1.000000e+30 : f32
    "tpu.trace_stop"() : () -> ()
    %25 = vector.shape_cast %15 : vector<1x8x8xi1> to vector<1x8x8xi1>
    %26 = vector.broadcast %25 : vector<1x8x8xi1> to vector<2x8x8xi1>
    %27 = vector.broadcast %cst_9 : f32 to vector<2x8x8xf32>
    %28 = arith.select %26, %27, %24 : vector<2x8x8xi1>, vector<2x8x8xf32>
    %cst_10 = arith.constant dense<0xFF800000> : vector<2x8xf32>
    %29 = vector.multi_reduction <maximumf>, %28, %cst_10 [2] : vector<2x8x8xf32> to vector<2x8xf32>
    %30 = vector.shape_cast %29 : vector<2x8xf32> to vector<2x8x1xf32>
    %31 = vector.broadcast %30 : vector<2x8x1xf32> to vector<2x8x8xf32>
    %32 = arith.subf %28, %31 : vector<2x8x8xf32>
    %33 = math.exp %32 : vector<2x8x8xf32>
    %cst_11 = arith.constant dense<0.000000e+00> : vector<2x8xf32>
    %34 = vector.multi_reduction <add>, %33, %cst_11 [2] : vector<2x8x8xf32> to vector<2x8xf32>
    %35 = vector.shape_cast %34 : vector<2x8xf32> to vector<2x8x1xf32>
    %36 = tpu.reciprocal %35 {approx = true} : vector<2x8x1xf32> -> vector<2x8x1xf32>
    %37 = vector.broadcast %36 : vector<2x8x1xf32> to vector<2x8x8xf32>
    %38 = arith.mulf %33, %37 : vector<2x8x8xf32>
    %39 = arith.truncf %38 : vector<2x8x8xf32> to vector<2x8x8xbf16>
    %40 = arith.truncf %21 : vector<2x8x8xf32> to vector<2x8x8xbf16>
    "tpu.trace_start"() <{level = 10 : i32, message = "bqk,bkd->bqd"}> : () -> ()
    %cst_12 = arith.constant dense<0.000000e+00> : vector<2x8x8xf32>
    %41 = tpu.matmul %39, %40, %cst_12 {dimension_numbers = #tpu.dot_dimension_numbers<[2], [1], [1], [2], [0, 0, 0, 1, 1, 2], [0], [0]>} : vector<2x8x8xbf16>, vector<2x8x8xbf16>, vector<2x8x8xf32> -> vector<2x8x8xf32>
    "tpu.trace_stop"() : () -> ()
    %42 = vector.shape_cast %41 : vector<2x8x8xf32> to vector<16x8xf32>
    %c0_13 = arith.constant 0 : index
    %c0_14 = arith.constant 0 : index
    %43 = vector.load %arg16[%c0_13, %c0_14] : memref<16x32xf32, #tpu.memory_space<vmem>>, vector<16x8xf32>
    tpu.vector_store %arg16[%c0_13, %c0_14], %42 {strides = array<i32>} : memref<16x32xf32, #tpu.memory_space<vmem>>, vector<16x8xf32>,
    %44 = vector.extract_strided_slice %11 {offsets = [0, 8], sizes = [16, 8], strides = [1, 1]} : vector<16x96xf32> to vector<16x8xf32>
    %45 = vector.shape_cast %44 : vector<16x8xf32> to vector<2x8x8xf32>
    %46 = vector.extract_strided_slice %11 {offsets = [0, 40], sizes = [16, 8], strides = [1, 1]} : vector<16x96xf32> to vector<16x8xf32>
    %47 = vector.shape_cast %46 : vector<16x8xf32> to vector<2x8x8xf32>
    %48 = vector.extract_strided_slice %11 {offsets = [0, 72], sizes = [16, 8], strides = [1, 1]} : vector<16x96xf32> to vector<16x8xf32>
    %49 = vector.shape_cast %48 : vector<16x8xf32> to vector<2x8x8xf32>
    %50 = arith.truncf %45 : vector<2x8x8xf32> to vector<2x8x8xbf16>
    %51 = arith.truncf %47 : vector<2x8x8xf32> to vector<2x8x8xbf16>
    "tpu.trace_start"() <{level = 10 : i32, message = "bqd,bkd->bqk"}> : () -> ()
    %cst_15 = arith.constant dense<0.000000e+00> : vector<2x8x8xf32>
    %52 = tpu.matmul %50, %51, %cst_15 {dimension_numbers = #tpu.dot_dimension_numbers<[2], [2], [1], [1], [0, 0, 0, 1, 1, 1], [0], [0]>} : vector<2x8x8xbf16>, vector<2x8x8xbf16>, vector<2x8x8xf32> -> vector<2x8x8xf32>
    %cst_16 = arith.constant -1.000000e+30 : f32
    "tpu.trace_stop"() : () -> ()
    %53 = vector.shape_cast %15 : vector<1x8x8xi1> to vector<1x8x8xi1>
    %54 = vector.broadcast %53 : vector<1x8x8xi1> to vector<2x8x8xi1>
    %55 = vector.broadcast %cst_16 : f32 to vector<2x8x8xf32>
    %56 = arith.select %54, %55, %52 : vector<2x8x8xi1>, vector<2x8x8xf32>
    %cst_17 = arith.constant dense<0xFF800000> : vector<2x8xf32>
    %57 = vector.multi_reduction <maximumf>, %56, %cst_17 [2] : vector<2x8x8xf32> to vector<2x8xf32>
    %58 = vector.shape_cast %57 : vector<2x8xf32> to vector<2x8x1xf32>
    %59 = vector.broadcast %58 : vector<2x8x1xf32> to vector<2x8x8xf32>
    %60 = arith.subf %56, %59 : vector<2x8x8xf32>
    %61 = math.exp %60 : vector<2x8x8xf32>
    %cst_18 = arith.constant dense<0.000000e+00> : vector<2x8xf32>
    %62 = vector.multi_reduction <add>, %61, %cst_18 [2] : vector<2x8x8xf32> to vector<2x8xf32>
    %63 = vector.shape_cast %62 : vector<2x8xf32> to vector<2x8x1xf32>
    %64 = tpu.reciprocal %63 {approx = true} : vector<2x8x1xf32> -> vector<2x8x1xf32>
    %65 = vector.broadcast %64 : vector<2x8x1xf32> to vector<2x8x8xf32>
    %66 = arith.mulf %61, %65 : vector<2x8x8xf32>
    %67 = arith.truncf %66 : vector<2x8x8xf32> to vector<2x8x8xbf16>
    %68 = arith.truncf %49 : vector<2x8x8xf32> to vector<2x8x8xbf16>
    "tpu.trace_start"() <{level = 10 : i32, message = "bqk,bkd->bqd"}> : () -> ()
    %cst_19 = arith.constant dense<0.000000e+00> : vector<2x8x8xf32>
    %69 = tpu.matmul %67, %68, %cst_19 {dimension_numbers = #tpu.dot_dimension_numbers<[2], [1], [1], [2], [0, 0, 0, 1, 1, 2], [0], [0]>} : vector<2x8x8xbf16>, vector<2x8x8xbf16>, vector<2x8x8xf32> -> vector<2x8x8xf32>
    "tpu.trace_stop"() : () -> ()
    %70 = vector.shape_cast %69 : vector<2x8x8xf32> to vector<16x8xf32>
    %c0_20 = arith.constant 0 : index
    %c8 = arith.constant 8 : index
    %71 = vector.load %arg16[%c0_20, %c8] : memref<16x32xf32, #tpu.memory_space<vmem>>, vector<16x8xf32>
    tpu.vector_store %arg16[%c0_20, %c8], %70 {strides = array<i32>} : memref<16x32xf32, #tpu.memory_space<vmem>>, vector<16x8xf32>,
    %72 = vector.extract_strided_slice %11 {offsets = [0, 16], sizes = [16, 8], strides = [1, 1]} : vector<16x96xf32> to vector<16x8xf32>
    %73 = vector.shape_cast %72 : vector<16x8xf32> to vector<2x8x8xf32>
    %74 = vector.extract_strided_slice %11 {offsets = [0, 48], sizes = [16, 8], strides = [1, 1]} : vector<16x96xf32> to vector<16x8xf32>
    %75 = vector.shape_cast %74 : vector<16x8xf32> to vector<2x8x8xf32>
    %76 = vector.extract_strided_slice %11 {offsets = [0, 80], sizes = [16, 8], strides = [1, 1]} : vector<16x96xf32> to vector<16x8xf32>
    %77 = vector.shape_cast %76 : vector<16x8xf32> to vector<2x8x8xf32>
    %78 = arith.truncf %73 : vector<2x8x8xf32> to vector<2x8x8xbf16>
    %79 = arith.truncf %75 : vector<2x8x8xf32> to vector<2x8x8xbf16>
    "tpu.trace_start"() <{level = 10 : i32, message = "bqd,bkd->bqk"}> : () -> ()
    %cst_21 = arith.constant dense<0.000000e+00> : vector<2x8x8xf32>
    %80 = tpu.matmul %78, %79, %cst_21 {dimension_numbers = #tpu.dot_dimension_numbers<[2], [2], [1], [1], [0, 0, 0, 1, 1, 1], [0], [0]>} : vector<2x8x8xbf16>, vector<2x8x8xbf16>, vector<2x8x8xf32> -> vector<2x8x8xf32>
    %cst_22 = arith.constant -1.000000e+30 : f32
    "tpu.trace_stop"() : () -> ()
    %81 = vector.shape_cast %15 : vector<1x8x8xi1> to vector<1x8x8xi1>
    %82 = vector.broadcast %81 : vector<1x8x8xi1> to vector<2x8x8xi1>
    %83 = vector.broadcast %cst_22 : f32 to vector<2x8x8xf32>
    %84 = arith.select %82, %83, %80 : vector<2x8x8xi1>, vector<2x8x8xf32>
    %cst_23 = arith.constant dense<0xFF800000> : vector<2x8xf32>
    %85 = vector.multi_reduction <maximumf>, %84, %cst_23 [2] : vector<2x8x8xf32> to vector<2x8xf32>
    %86 = vector.shape_cast %85 : vector<2x8xf32> to vector<2x8x1xf32>
    %87 = vector.broadcast %86 : vector<2x8x1xf32> to vector<2x8x8xf32>
    %88 = arith.subf %84, %87 : vector<2x8x8xf32>
    %89 = math.exp %88 : vector<2x8x8xf32>
    %cst_24 = arith.constant dense<0.000000e+00> : vector<2x8xf32>
    %90 = vector.multi_reduction <add>, %89, %cst_24 [2] : vector<2x8x8xf32> to vector<2x8xf32>
    %91 = vector.shape_cast %90 : vector<2x8xf32> to vector<2x8x1xf32>
    %92 = tpu.reciprocal %91 {approx = true} : vector<2x8x1xf32> -> vector<2x8x1xf32>
    %93 = vector.broadcast %92 : vector<2x8x1xf32> to vector<2x8x8xf32>
    %94 = arith.mulf %89, %93 : vector<2x8x8xf32>
    %95 = arith.truncf %94 : vector<2x8x8xf32> to vector<2x8x8xbf16>
    %96 = arith.truncf %77 : vector<2x8x8xf32> to vector<2x8x8xbf16>
    "tpu.trace_start"() <{level = 10 : i32, message = "bqk,bkd->bqd"}> : () -> ()
    %cst_25 = arith.constant dense<0.000000e+00> : vector<2x8x8xf32>
    %97 = tpu.matmul %95, %96, %cst_25 {dimension_numbers = #tpu.dot_dimension_numbers<[2], [1], [1], [2], [0, 0, 0, 1, 1, 2], [0], [0]>} : vector<2x8x8xbf16>, vector<2x8x8xbf16>, vector<2x8x8xf32> -> vector<2x8x8xf32>
    "tpu.trace_stop"() : () -> ()
    %98 = vector.shape_cast %97 : vector<2x8x8xf32> to vector<16x8xf32>
    %c0_26 = arith.constant 0 : index
    %c16 = arith.constant 16 : index
    %99 = vector.load %arg16[%c0_26, %c16] : memref<16x32xf32, #tpu.memory_space<vmem>>, vector<16x8xf32>
    tpu.vector_store %arg16[%c0_26, %c16], %98 {strides = array<i32>} : memref<16x32xf32, #tpu.memory_space<vmem>>, vector<16x8xf32>,
    %100 = vector.extract_strided_slice %11 {offsets = [0, 24], sizes = [16, 8], strides = [1, 1]} : vector<16x96xf32> to vector<16x8xf32>
    %101 = vector.shape_cast %100 : vector<16x8xf32> to vector<2x8x8xf32>
    %102 = vector.extract_strided_slice %11 {offsets = [0, 56], sizes = [16, 8], strides = [1, 1]} : vector<16x96xf32> to vector<16x8xf32>
    %103 = vector.shape_cast %102 : vector<16x8xf32> to vector<2x8x8xf32>
    %104 = vector.extract_strided_slice %11 {offsets = [0, 88], sizes = [16, 8], strides = [1, 1]} : vector<16x96xf32> to vector<16x8xf32>
    %105 = vector.shape_cast %104 : vector<16x8xf32> to vector<2x8x8xf32>
    %106 = arith.truncf %101 : vector<2x8x8xf32> to vector<2x8x8xbf16>
    %107 = arith.truncf %103 : vector<2x8x8xf32> to vector<2x8x8xbf16>
    "tpu.trace_start"() <{level = 10 : i32, message = "bqd,bkd->bqk"}> : () -> ()
    %cst_27 = arith.constant dense<0.000000e+00> : vector<2x8x8xf32>
    %108 = tpu.matmul %106, %107, %cst_27 {dimension_numbers = #tpu.dot_dimension_numbers<[2], [2], [1], [1], [0, 0, 0, 1, 1, 1], [0], [0]>} : vector<2x8x8xbf16>, vector<2x8x8xbf16>, vector<2x8x8xf32> -> vector<2x8x8xf32>
    %cst_28 = arith.constant -1.000000e+30 : f32
    "tpu.trace_stop"() : () -> ()
    %109 = vector.shape_cast %15 : vector<1x8x8xi1> to vector<1x8x8xi1>
    %110 = vector.broadcast %109 : vector<1x8x8xi1> to vector<2x8x8xi1>
    %111 = vector.broadcast %cst_28 : f32 to vector<2x8x8xf32>
    %112 = arith.select %110, %111, %108 : vector<2x8x8xi1>, vector<2x8x8xf32>
    %cst_29 = arith.constant dense<0xFF800000> : vector<2x8xf32>
    %113 = vector.multi_reduction <maximumf>, %112, %cst_29 [2] : vector<2x8x8xf32> to vector<2x8xf32>
    %114 = vector.shape_cast %113 : vector<2x8xf32> to vector<2x8x1xf32>
    %115 = vector.broadcast %114 : vector<2x8x1xf32> to vector<2x8x8xf32>
    %116 = arith.subf %112, %115 : vector<2x8x8xf32>
    %117 = math.exp %116 : vector<2x8x8xf32>
    %cst_30 = arith.constant dense<0.000000e+00> : vector<2x8xf32>
    %118 = vector.multi_reduction <add>, %117, %cst_30 [2] : vector<2x8x8xf32> to vector<2x8xf32>
    %119 = vector.shape_cast %118 : vector<2x8xf32> to vector<2x8x1xf32>
    %120 = tpu.reciprocal %119 {approx = true} : vector<2x8x1xf32> -> vector<2x8x1xf32>
    %121 = vector.broadcast %120 : vector<2x8x1xf32> to vector<2x8x8xf32>
    %122 = arith.mulf %117, %121 : vector<2x8x8xf32>
    %123 = arith.truncf %122 : vector<2x8x8xf32> to vector<2x8x8xbf16>
    %124 = arith.truncf %105 : vector<2x8x8xf32> to vector<2x8x8xbf16>
    "tpu.trace_start"() <{level = 10 : i32, message = "bqk,bkd->bqd"}> : () -> ()
    %cst_31 = arith.constant dense<0.000000e+00> : vector<2x8x8xf32>
    %125 = tpu.matmul %123, %124, %cst_31 {dimension_numbers = #tpu.dot_dimension_numbers<[2], [1], [1], [2], [0, 0, 0, 1, 1, 2], [0], [0]>} : vector<2x8x8xbf16>, vector<2x8x8xbf16>, vector<2x8x8xf32> -> vector<2x8x8xf32>
    "tpu.trace_stop"() : () -> ()
    %126 = vector.shape_cast %125 : vector<2x8x8xf32> to vector<16x8xf32>
    %c0_32 = arith.constant 0 : index
    %c24 = arith.constant 24 : index
    %127 = vector.load %arg16[%c0_32, %c24] : memref<16x32xf32, #tpu.memory_space<vmem>>, vector<16x8xf32>
    tpu.vector_store %arg16[%c0_32, %c24], %126 {strides = array<i32>} : memref<16x32xf32, #tpu.memory_space<vmem>>, vector<16x8xf32>,
    %c0_33 = arith.constant 0 : index
    %c0_34 = arith.constant 0 : index
    %128 = vector.load %arg16[%c0_33, %c0_34] : memref<16x32xf32, #tpu.memory_space<vmem>>, vector<16x32xf32>
    %129 = arith.truncf %128 : vector<16x32xf32> to vector<16x32xbf16>
    %c0_35 = arith.constant 0 : index
    %c0_36 = arith.constant 0 : index
    %c0_37 = arith.constant 0 : index
    %130 = vector.load %arg5[%c0_35, %c0_36, %c0_37] : memref<1x32x32xbf16, #tpu.memory_space<vmem>>, vector<1x32x32xbf16>
    %131 = vector.shape_cast %130 : vector<1x32x32xbf16> to vector<32x32xbf16>
    %cst_38 = arith.constant dense<0.000000e+00> : vector<16x32xf32>
    %132 = tpu.matmul %129, %131, %cst_38 {dimension_numbers = #tpu.dot_dimension_numbers<[1], [0], [0], [1], [0, 0, 1, 1], [], []>} : vector<16x32xbf16>, vector<32x32xbf16>, vector<16x32xf32> -> vector<16x32xf32>
    %c0_39 = arith.constant 0 : index
    %c0_40 = arith.constant 0 : index
    %c0_41 = arith.constant 0 : index
    %133 = vector.load %arg6[%c0_39, %c0_40, %c0_41] : memref<1x1x32xf32, #tpu.memory_space<vmem>>, vector<1x1x32xf32>
    %134 = vector.shape_cast %133 : vector<1x1x32xf32> to vector<1x32xf32>
    %135 = vector.broadcast %134 : vector<1x32xf32> to vector<16x32xf32>
    %136 = arith.addf %132, %135 : vector<16x32xf32>
    %137 = arith.addf %3, %136 : vector<16x32xf32>
    %cst_42 = arith.constant dense<0.000000e+00> : vector<16xf32>
    %138 = vector.multi_reduction <add>, %137, %cst_42 [1] : vector<16x32xf32> to vector<16xf32>
    %139 = vector.shape_cast %138 : vector<16xf32> to vector<16x1xf32>
    %cst_43 = arith.constant 3.200000e+01 : f32
    %140 = vector.broadcast %cst_43 : f32 to vector<16x1xf32>
    %141 = arith.divf %139, %140 : vector<16x1xf32>
    %142 = vector.broadcast %141 : vector<16x1xf32> to vector<16x32xf32>
    %143 = arith.subf %137, %142 : vector<16x32xf32>
    %144 = arith.mulf %143, %143 : vector<16x32xf32>
    %cst_44 = arith.constant dense<0.000000e+00> : vector<16xf32>
    %145 = vector.multi_reduction <add>, %144, %cst_44 [1] : vector<16x32xf32> to vector<16xf32>
    %146 = vector.shape_cast %145 : vector<16xf32> to vector<16x1xf32>
    %cst_45 = arith.constant 3.200000e+01 : f32
    %147 = vector.broadcast %cst_45 : f32 to vector<16x1xf32>
    %148 = arith.divf %146, %147 : vector<16x1xf32>
    %149 = vector.broadcast %141 : vector<16x1xf32> to vector<16x32xf32>
    %150 = arith.subf %137, %149 : vector<16x32xf32>
    %cst_46 = arith.constant 9.99999974E-6 : f32
    %151 = vector.broadcast %cst_46 : f32 to vector<16x1xf32>
    %152 = arith.addf %148, %151 : vector<16x1xf32>
    %153 = math.rsqrt %152 : vector<16x1xf32>
    %154 = vector.broadcast %153 : vector<16x1xf32> to vector<16x32xf32>
    %155 = arith.mulf %150, %154 : vector<16x32xf32>
    %c0_47 = arith.constant 0 : index
    %c0_48 = arith.constant 0 : index
    %c0_49 = arith.constant 0 : index
    %156 = vector.load %arg7[%c0_47, %c0_48, %c0_49] : memref<1x1x32xf32, #tpu.memory_space<vmem>>, vector<1x1x32xf32>
    %157 = vector.shape_cast %156 : vector<1x1x32xf32> to vector<1x32xf32>
    %158 = vector.broadcast %157 : vector<1x32xf32> to vector<16x32xf32>
    %159 = arith.mulf %155, %158 : vector<16x32xf32>
    %c0_50 = arith.constant 0 : index
    %c0_51 = arith.constant 0 : index
    %c0_52 = arith.constant 0 : index
    %160 = vector.load %arg8[%c0_50, %c0_51, %c0_52] : memref<1x1x32xf32, #tpu.memory_space<vmem>>, vector<1x1x32xf32>
    %161 = vector.shape_cast %160 : vector<1x1x32xf32> to vector<1x32xf32>
    %162 = vector.broadcast %161 : vector<1x32xf32> to vector<16x32xf32>
    %163 = arith.addf %159, %162 : vector<16x32xf32>
    %164 = arith.truncf %163 : vector<16x32xf32> to vector<16x32xbf16>
    %c0_53 = arith.constant 0 : index
    %c0_54 = arith.constant 0 : index
    %c0_55 = arith.constant 0 : index
    %165 = vector.load %arg9[%c0_53, %c0_54, %c0_55] : memref<1x32x64xbf16, #tpu.memory_space<vmem>>, vector<1x32x64xbf16>
    %166 = vector.shape_cast %165 : vector<1x32x64xbf16> to vector<32x64xbf16>
    %cst_56 = arith.constant dense<0.000000e+00> : vector<16x64xf32>
    %167 = tpu.matmul %164, %166, %cst_56 {dimension_numbers = #tpu.dot_dimension_numbers<[1], [0], [0], [1], [0, 0, 1, 1], [], []>} : vector<16x32xbf16>, vector<32x64xbf16>, vector<16x64xf32> -> vector<16x64xf32>
    %c0_57 = arith.constant 0 : index
    %c0_58 = arith.constant 0 : index
    %c0_59 = arith.constant 0 : index
    %168 = vector.load %arg10[%c0_57, %c0_58, %c0_59] : memref<1x1x64xf32, #tpu.memory_space<vmem>>, vector<1x1x64xf32>
    %169 = vector.shape_cast %168 : vector<1x1x64xf32> to vector<1x64xf32>
    %170 = vector.broadcast %169 : vector<1x64xf32> to vector<16x64xf32>
    %171 = arith.addf %167, %170 : vector<16x64xf32>
    %cst_60 = arith.constant 0.000000e+00 : f32
    %172 = vector.broadcast %cst_60 : f32 to vector<16x64xf32>
    %173 = arith.maximumf %171, %172 : vector<16x64xf32>
    %174 = arith.truncf %173 : vector<16x64xf32> to vector<16x64xbf16>
    %c0_61 = arith.constant 0 : index
    %c0_62 = arith.constant 0 : index
    %c0_63 = arith.constant 0 : index
    %175 = vector.load %arg11[%c0_61, %c0_62, %c0_63] : memref<1x64x32xbf16, #tpu.memory_space<vmem>>, vector<1x64x32xbf16>
    %176 = vector.shape_cast %175 : vector<1x64x32xbf16> to vector<64x32xbf16>
    %cst_64 = arith.constant dense<0.000000e+00> : vector<16x32xf32>
    %177 = tpu.matmul %174, %176, %cst_64 {dimension_numbers = #tpu.dot_dimension_numbers<[1], [0], [0], [1], [0, 0, 1, 1], [], []>} : vector<16x64xbf16>, vector<64x32xbf16>, vector<16x32xf32> -> vector<16x32xf32>
    %c0_65 = arith.constant 0 : index
    %c0_66 = arith.constant 0 : index
    %c0_67 = arith.constant 0 : index
    %178 = vector.load %arg12[%c0_65, %c0_66, %c0_67] : memref<1x1x32xf32, #tpu.memory_space<vmem>>, vector<1x1x32xf32>
    %179 = vector.shape_cast %178 : vector<1x1x32xf32> to vector<1x32xf32>
    %180 = vector.broadcast %179 : vector<1x32xf32> to vector<16x32xf32>
    %181 = arith.addf %177, %180 : vector<16x32xf32>
    %182 = arith.addf %163, %181 : vector<16x32xf32>
    %cst_68 = arith.constant dense<0.000000e+00> : vector<16xf32>
    %183 = vector.multi_reduction <add>, %182, %cst_68 [1] : vector<16x32xf32> to vector<16xf32>
    %184 = vector.shape_cast %183 : vector<16xf32> to vector<16x1xf32>
    %cst_69 = arith.constant 3.200000e+01 : f32
    %185 = vector.broadcast %cst_69 : f32 to vector<16x1xf32>
    %186 = arith.divf %184, %185 : vector<16x1xf32>
    %187 = vector.broadcast %186 : vector<16x1xf32> to vector<16x32xf32>
    %188 = arith.subf %182, %187 : vector<16x32xf32>
    %189 = arith.mulf %188, %188 : vector<16x32xf32>
    %cst_70 = arith.constant dense<0.000000e+00> : vector<16xf32>
    %190 = vector.multi_reduction <add>, %189, %cst_70 [1] : vector<16x32xf32> to vector<16xf32>
    %191 = vector.shape_cast %190 : vector<16xf32> to vector<16x1xf32>
    %cst_71 = arith.constant 3.200000e+01 : f32
    %192 = vector.broadcast %cst_71 : f32 to vector<16x1xf32>
    %193 = arith.divf %191, %192 : vector<16x1xf32>
    %194 = vector.broadcast %186 : vector<16x1xf32> to vector<16x32xf32>
    %195 = arith.subf %182, %194 : vector<16x32xf32>
    %cst_72 = arith.constant 9.99999974E-6 : f32
    %196 = vector.broadcast %cst_72 : f32 to vector<16x1xf32>
    %197 = arith.addf %193, %196 : vector<16x1xf32>
    %198 = math.rsqrt %197 : vector<16x1xf32>
    %199 = vector.broadcast %198 : vector<16x1xf32> to vector<16x32xf32>
    %200 = arith.mulf %195, %199 : vector<16x32xf32>
    %c0_73 = arith.constant 0 : index
    %c0_74 = arith.constant 0 : index
    %c0_75 = arith.constant 0 : index
    %201 = vector.load %arg13[%c0_73, %c0_74, %c0_75] : memref<1x1x32xf32, #tpu.memory_space<vmem>>, vector<1x1x32xf32>
    %202 = vector.shape_cast %201 : vector<1x1x32xf32> to vector<1x32xf32>
    %203 = vector.broadcast %202 : vector<1x32xf32> to vector<16x32xf32>
    %204 = arith.mulf %200, %203 : vector<16x32xf32>
    %c0_76 = arith.constant 0 : index
    %c0_77 = arith.constant 0 : index
    %c0_78 = arith.constant 0 : index
    %205 = vector.load %arg14[%c0_76, %c0_77, %c0_78] : memref<1x1x32xf32, #tpu.memory_space<vmem>>, vector<1x1x32xf32>
    %206 = vector.shape_cast %205 : vector<1x1x32xf32> to vector<1x32xf32>
    %207 = vector.broadcast %206 : vector<1x32xf32> to vector<16x32xf32>
    %208 = arith.addf %204, %207 : vector<16x32xf32>
    %c0_79 = arith.constant 0 : index
    %c0_80 = arith.constant 0 : index
    %209 = vector.load %arg15[%c0_79, %c0_80] : memref<16x32xf32, #tpu.memory_space<vmem>>, vector<16x32xf32>
    tpu.vector_store %arg15[%c0_79, %c0_80], %208 {strides = array<i32>} : memref<16x32xf32, #tpu.memory_space<vmem>>, vector<16x32xf32>,
    return
  }
  func.func @transform_0(%arg0: i32, %arg1: i32) -> (i32, i32) {
    %c0_i32 = arith.constant 0 : i32
    %c0_i32_0 = arith.constant 0 : i32
    return %arg0, %c0_i32 : i32, i32
  }
  func.func @transform_1(%arg0: i32, %arg1: i32) -> (i32, i32, i32) {
    %c0_i32 = arith.constant 0 : i32
    %c0_i32_0 = arith.constant 0 : i32
    %c0_i32_1 = arith.constant 0 : i32
    return %arg1, %c0_i32, %c0_i32_0 : i32, i32, i32
  }
  func.func @transform_2(%arg0: i32, %arg1: i32) -> (i32, i32, i32) {
    %c0_i32 = arith.constant 0 : i32
    %c0_i32_0 = arith.constant 0 : i32
    %c0_i32_1 = arith.constant 0 : i32
    return %arg1, %c0_i32, %c0_i32_0 : i32, i32, i32
  }
  func.func @transform_3(%arg0: i32, %arg1: i32) -> (i32, i32, i32) {
    %c0_i32 = arith.constant 0 : i32
    %c0_i32_0 = arith.constant 0 : i32
    %c0_i32_1 = arith.constant 0 : i32
    return %arg1, %c0_i32, %c0_i32_0 : i32, i32, i32
  }
  func.func @transform_4(%arg0: i32, %arg1: i32) -> (i32, i32, i32) {
    %c0_i32 = arith.constant 0 : i32
    %c0_i32_0 = arith.constant 0 : i32
    %c0_i32_1 = arith.constant 0 : i32
    return %arg1, %c0_i32, %c0_i32_0 : i32, i32, i32
  }
  func.func @transform_5(%arg0: i32, %arg1: i32) -> (i32, i32, i32) {
    %c0_i32 = arith.constant 0 : i32
    %c0_i32_0 = arith.constant 0 : i32
    %c0_i32_1 = arith.constant 0 : i32
    return %arg1, %c0_i32, %c0_i32_0 : i32, i32, i32
  }
  func.func @transform_6(%arg0: i32, %arg1: i32) -> (i32, i32, i32) {
    %c0_i32 = arith.constant 0 : i32
    %c0_i32_0 = arith.constant 0 : i32
    %c0_i32_1 = arith.constant 0 : i32
    return %arg1, %c0_i32, %c0_i32_0 : i32, i32, i32
  }
  func.func @transform_7(%arg0: i32, %arg1: i32) -> (i32, i32, i32) {
    %c0_i32 = arith.constant 0 : i32
    %c0_i32_0 = arith.constant 0 : i32
    %c0_i32_1 = arith.constant 0 : i32
    return %arg1, %c0_i32, %c0_i32_0 : i32, i32, i32
  }
  func.func @transform_8(%arg0: i32, %arg1: i32) -> (i32, i32, i32) {
    %c0_i32 = arith.constant 0 : i32
    %c0_i32_0 = arith.constant 0 : i32
    %c0_i32_1 = arith.constant 0 : i32
    return %arg1, %c0_i32, %c0_i32_0 : i32, i32, i32
  }
  func.func @transform_9(%arg0: i32, %arg1: i32) -> (i32, i32, i32) {
    %c0_i32 = arith.constant 0 : i32
    %c0_i32_0 = arith.constant 0 : i32
    %c0_i32_1 = arith.constant 0 : i32
    return %arg1, %c0_i32, %c0_i32_0 : i32, i32, i32
  }
  func.func @transform_10(%arg0: i32, %arg1: i32) -> (i32, i32, i32) {
    %c0_i32 = arith.constant 0 : i32
    %c0_i32_0 = arith.constant 0 : i32
    %c0_i32_1 = arith.constant 0 : i32
    return %arg1, %c0_i32, %c0_i32_0 : i32, i32, i32
  }
  func.func @transform_11(%arg0: i32, %arg1: i32) -> (i32, i32, i32) {
    %c0_i32 = arith.constant 0 : i32
    %c0_i32_0 = arith.constant 0 : i32
    %c0_i32_1 = arith.constant 0 : i32
    return %arg1, %c0_i32, %c0_i32_0 : i32, i32, i32
  }
  func.func @transform_12(%arg0: i32, %arg1: i32) -> (i32, i32, i32) {
    %c0_i32 = arith.constant 0 : i32
    %c0_i32_0 = arith.constant 0 : i32
    %c0_i32_1 = arith.constant 0 : i32
    return %arg1, %c0_i32, %c0_i32_0 : i32, i32, i32
  }
  func.func @transform_13(%arg0: i32, %arg1: i32) -> (i32, i32) {
    %c0_i32 = arith.constant 0 : i32
    %c0_i32_0 = arith.constant 0 : i32
    return %arg0, %c0_i32 : i32, i32
  }
}

</mosaic_0001>

<bundles_post_ra>
// kernel: tpu_custom_call.1
= control target key start
LH: loop header
LB: loop body
LE: loop exit
PB: predicated region body
PF: predicated region fallthrough
CT: control target
= control target key end

     0   :  { %s2666_s0 = inlined_call_operand.hbm [shape: f32[16,32], index: 0, kind: input, shape index: {}]   ;;  %s2667_s1 = inlined_call_operand.vmem [shape: bf16[2,32,96], index: 1, kind: input, shape index: {}]   ;;  %s2668_s2 = inlined_call_operand.hbm [shape: f32[2,1,96], index: 2, kind: input, shape index: {}]   ;;  %s2669_s3 = inlined_call_operand.vmem [shape: bf16[2,32,32], index: 3, kind: input, shape index: {}]   ;;  %s2670_s4 = inlined_call_operand.vmem [shape: f32[2,1,32], index: 4, kind: input, shape index: {}]   ;;  %s2671_s5 = inlined_call_operand.hbm [shape: f32[2,1,32], index: 5, kind: input, shape index: {}]   ;;  %s2672_s6 = inlined_call_operand.vmem [shape: f32[2,1,32], index: 6, kind: input, shape index: {}]   ;;  %s2673_s7 = inlined_call_operand.vmem [shape: bf16[2,32,64], index: 7, kind: input, shape index: {}]   ;;  %s2674_s8 = inlined_call_operand.vmem [shape: f32[2,1,64], index: 8, kind: input, shape index: {}]   ;;  %s2675_s9 = inlined_call_operand.vmem [shape: bf16[2,64,32], index: 9, kind: input, shape index: {}]   ;;  %s2676_s10 = inlined_call_operand.vmem [shape: f32[2,1,32], index: 10, kind: input, shape index: {}]   ;;  %s2677_s11 = inlined_call_operand.hbm [shape: f32[2,1,32], index: 11, kind: input, shape index: {}]   ;;  %s2678_s12 = inlined_call_operand.vmem [shape: f32[2,1,32], index: 12, kind: input, shape index: {}]   ;;  %s2679_s13 = inlined_call_operand.hbm [shape: f32[16,32], index: 13, kind: output, shape index: {}]  }
   0x1   :  { %2683 = sst [smem:[#allocation20_spill]] %s2666_s0 }
   0x2   :  { %2684 = sst [smem:[#allocation21_spill]] %s2667_s1 }
   0x3   :  { %2685 = sst [smem:[#allocation22_spill]] %s2668_s2 }
   0x4   :  { %2686 = sst [smem:[#allocation23_spill]] %s2669_s3 }
   0x5   :  { %2687 = sst [smem:[#allocation24_spill]] %s2671_s5 }
   0x6   :  { %2688 = sst [smem:[#allocation25_spill]] %s2674_s8 }
   0x7   :  { %2689 = sst [smem:[#allocation26_spill]] %s2675_s9 }
   0x8   :  { %2690 = sst [smem:[#allocation27_spill]] %s2676_s10 }
   0x9   :  { %2691 = sst [smem:[#allocation28_spill]] %s2677_s11 }
   0xa   :  { %2692 = sst [smem:[#allocation29_spill]] %s2678_s12 }
   0xb   :  { %2693 = sst [smem:[#allocation30_spill]] %s2679_s13 }
   0xc   :  { %18 = vsyncpa [#allocation4], 0 }
   0xd   :  { %19 = vsyncpa [#allocation7], 0 }
   0xe   :  { %21 = vsyncpa [#allocation7 + $0x1], 0 }
   0xf   :  { %22 = vsyncpa [#allocation10], 0 }
  0x10   :  { %24 = vsyncpa [#allocation10 + $0x1], 0 }
  0x11   :  { %25 = vsyncpa [#allocation5], 0  ;;  %s2277_s25 = smov 0   ;;  %s2279_s26 = smov 0  }
  0x12   :  { %s2281_s27 = smov 0   ;;  %s2283_s28 = smov 0  }
  0x13   :  { %s2285_s29 = smov 0   ;;  %s2287_s30 = smov 0  }
  0x14 LB: > { %2694 = sst [smem:[#allocation16_spill]] %s2173_s27  ;;  %s40_s14 = sadd.s32 1, %s2181_s29  ;;  %s2185_s30 = sphi %s2287_s30, %s31_s30   ;;  %s2181_s29 = sphi %s2285_s29, %s2730_s29   ;;  %s2177_s28 = sphi %s2283_s28, %s2729_s28   ;;  %s2173_s27 = sphi %s2281_s27, %s2725_s27   ;;  %s2169_s26 = sphi %s2279_s26, %s2728_s26   ;;  %s2165_s25 = sphi %s2277_s25, %s2727_s25  }
  0x15   : > { %2695 = sst [smem:[#allocation17_spill]] %s2185_s30  ;;  %s102_s15 = sadd.s32 1, %s2173_s27 }
  0x16   : > { %p41_p0 = scmp.ge.s32.totalorder %s40_s14, 2  ;;  %p109_p1 = scmp.ne.s32.totalorder %s2173_s27, %s2169_s26 }
  0x17   : > { %p110_p2 = scmp.eq.s32.totalorder %s2185_s30, 0  ;;  %p115_p3 = scmp.ne.s32.totalorder %s2169_s26, %s2165_s25 }
  0x18   : > { %s2732_s14 = smov (%p41_p0, %s40_s14), 0  ;;  %p1853_p5 = scmp.lt.s32.totalorder %s2185_s30, 2 }
  0x19   : > { %2696 = sst [smem:[#allocation18_spill]] %s2732_s14  ;;  %p2316_p4 = por %p110_p2, %p109_p1 }
  0x1a   : > { %s99_s17 = ssub.s32 %s2181_s29, %s2732_s14  ;;  %s450_s18 = sand.u32 1, %s2185_s30  }
  0x1b   : > { %p100_p6 = scmp.eq.s32.totalorder %s99_s17, 0  ;;  %s2325_s19 = sand.u32 1, %s2173_s27  }
  0x1c   : > { %s2699_s2 = sld [smem:[#allocation22_spill]]  ;;  %s453_s13 = scalar_lea.vmem [#allocation6], %s2325_s19 }
  0x1d   : > { %s2328_s20 = scalar_select %p100_p6, %s2173_s27, %s102_s15  }
  0x1e   : > { %s460_s12 = sshll.u32 %s453_s13, 4  ;;  %p2337_p7 = pnand %p1853_p5, %p2316_p4  ;;  %s461_s12 = int_to_ptr.vmem [resolvable:$true] %s460_s12 }
  0x1f   : > { %2698 = sst [smem:[#allocation19_spill]] %s2328_s20  ;;  %s2342_s14 = sadd.s32 4294967295, %s2185_s30  }
  0x20   : > { %p116_p8 = scmp.eq.s32.totalorder %s2342_s14, 0  ;;  %s451_s15 = scalar_lea.sflag [#allocation7], %s450_s18 }
  0x21   : > { %p1732_p10 = scmp.ge.s32.totalorder %s2185_s30, 1  ;;  %p412_p11 = scmp.lt.s32.totalorder %s2185_s30, 3 }
  0x22   : > { %s456_s23 = scalar_lea.hbm %s2699_s2, %s2181_s29  ;;  %p2352_p9 = por %p116_p8, %p115_p3 }
  0x23   : > { %s458_s24 = sshll.u32 %s456_s23, 4  ;;  %s2702_s0 = sld [smem:[#allocation20_spill]]  ;;  %s459_s24 = int_to_ptr.hbm [resolvable:$true] %s458_s24 }
  0x24   : > { %1845 = dma.hbm_to_vmem [thread:$0]  (!%p2337_p7), %s459_s24, 16, %s461_s12, %s451_s15  }
  0x25   : > { %p2361_p12 = pnand %p1732_p10, %p412_p11  ;;  %s2187_s12 = smov [#allocation3]  }
  0x26   : > { %s428_s25 = sshll.u32 %s2187_s12, 4  ;;  %s2704_s5 = sld [smem:[#allocation24_spill]]  ;;  %s429_s25 = int_to_ptr.vmem [resolvable:$true] %s428_s25 }
  0x27   : > { %p1838_p13 = pneg %p2361_p12  ;;  %s2188_s20 = smov 128  }
  0x28   : > { %s2189_s27 = smov 8   ;;  %s2705_s11 = sld [smem:[#allocation28_spill]] }
  0x29   : > { %s426_s22 = sshll.u32 %s2702_s0, 4  ;;  %p1839_p0 = pnand %p1838_p13, %p116_p8  ;;  %s427_s22 = int_to_ptr.hbm [resolvable:$true] %s426_s22 }
  0x2a   : > { %s484_s0 = scalar_lea.vmem [#allocation8], %s2325_s19  ;;  %s535_s8 = scalar_lea.vmem [#allocation9], %s2325_s19 }
  0x2b   : > { %s491_s2 = sshll.u32 %s484_s0, 4  ;;  %s542_s18 = sshll.u32 %s535_s8, 4  ;;  %s492_s2 = int_to_ptr.vmem [resolvable:$true] %s491_s2  ;;  %s543_s18 = int_to_ptr.vmem [resolvable:$true] %s542_s18 }
  0x2c   : > { %s487_s16 = scalar_lea.hbm %s2704_s5, %s2181_s29  ;;  %s533_s24 = scalar_lea.sflag [#allocation10], %s2325_s19 }
  0x2d   : > { %s489_s21 = sshll.u32 %s487_s16, 4  ;;  %s490_s21 = int_to_ptr.hbm [resolvable:$true] %s489_s21 }
  0x2e   : > { %1841 = dma.hbm_to_vmem [thread:$0]  (!%p1839_p0), %s427_s22, 256, %s429_s25, [#allocation4], %s2188_s20, %s2188_s20, %s2189_s27  }
  0x2f   : > { %1848 = dma.hbm_to_vmem [thread:$0]  (!%p2337_p7), %s490_s21, 16, %s492_s2, %s451_s15  }
  0x30   : > { %s538_s10 = scalar_lea.hbm %s2705_s11, %s2181_s29  ;;  %557 = sbr.rel (%p2361_p12) target bundleno = 2045 (0x7fd), region = 72 }
  0x31   : > { %s540_s9 = sshll.u32 %s538_s10, 4  ;;  %s541_s9 = int_to_ptr.hbm [resolvable:$true] %s540_s9 }
  0x32   : > { %1851 = dma.hbm_to_vmem [thread:$0]  (!%p2337_p7), %s541_s9, 16, %s543_s18, %s533_s24  }
  0x35   : > { %2148 = dma.done.wait (%p116_p8), [#allocation4], 256  }
  0x36   : > { %2150 = vsyncadd (%p116_p8), [#allocation4], 4294967040  ;;  %s564_s0 = sand.u32 1, %s2342_s14   ;;  %s2392_s2 = sand.u32 1, %s2169_s26  }
  0x37   : > { %s565_s8 = scalar_lea.sflag [#allocation7], %s564_s0 }
  0x38   : > { %2152 = dma.done.wait (%p2352_p9), %s565_s8, 32  }
  0x39   : > { %2154 = vsyncadd (%p2352_p9), %s565_s8, 4294967264  ;;  %s583_s27 = scalar_lea.sflag [#allocation10], %s2392_s2 }
  0x3a   : > { %2156 = dma.done.wait (%p2352_p9), %s583_s27, 16  }
  0x3b   : > { %2158 = vsyncadd (%p2352_p9), %s583_s27, 4294967280  ;;  %p667_p1 = scmp.lt.s32.totalorder %s2177_s28, 1  ;;  %s2706_s1 = sld [smem:[#allocation21_spill]] }
  0x3c   : > { %s2707_s3 = sld [smem:[#allocation23_spill]]  ;;  %p1745_p2 = scmp.ne.s32.totalorder %s2177_s28, 0 }
  0x3d   : > { %s2408_s19 = scalar_select %p667_p1, %s2177_s28, 1 }
  0x3e   : > { %s2708_s9 = sld [smem:[#allocation25_spill]] }
  0x3f   : > { %s1810_s20 = sshll.u32 %s2408_s19, 4  ;;  %s1813_s23 = sshll.u32 %s2408_s19, 5 }
  0x40   : > { %s2430_s30 = scalar_lea.vmem %s2673_s7, %s1810_s20  ;;  %s2710_s5 = sld [smem:[#allocation27_spill]] }
  0x41   : > { %s671_s25 = scalar_lea.vmem %s2706_s1, %s1810_s20  ;;  %s2709_s1 = sld [smem:[#allocation26_spill]] }
  0x42   : > { %s2421_s12 = scalar_lea.vmem %s2707_s3, %s1810_s20  ;;  %s2711_s11 = sld [smem:[#allocation29_spill]] }
  0x44   : > { %s690_s22 = scalar_lea.vmem %s2708_s9, %s2408_s19  ;;  %707 = sbr.rel (%p1745_p2) target bundleno = 76 (0x4c), region = 92 }
  0x46   : > { %s698_s18 = scalar_lea.vmem %s2710_s5, %s2408_s19 }
  0x47   : > { %s2440_s16 = scalar_lea.vmem %s2709_s1, %s1813_s23 }
  0x48   : > { %s701_s8 = scalar_lea.vmem %s2711_s11, %s2408_s19 }
  0x49   : > { %v708_v0 = vld [vmem:[#allocation3] sm:$0xff]  ;;  %vm710_vm0 = vcmask 261120   ;;  %v709_v1 = vld [vmem:[#allocation3 + $0x8] sm:$0xff] }
  0x4a   : > { %711 = vst.msk [vmem:[#allocation11] sm:$0xff] %vm710_vm0, %v708_v0 }
  0x4b   : > { %712 = vst.msk [vmem:[#allocation11 + $0x8] sm:$0xff] %vm710_vm0, %v709_v1 }
  0x4c PF: > { %v1815_v2 = vld [vmem:[%s671_s25 + $0x8] sm:$0xff]  ;;  %v1814_v3 = vld [vmem:[%s671_s25] sm:$0xff]  ;;  %vm736_vm1 = vcmask 261120   ;;  %s2712_s1 = scalar_lea.vmem [#allocation6], %s2392_s2  ;;  %s2190_s3 = smov 120   ;;  %vm766_vm2 = vcmask 64512   ;;  %v754_v40 = vlaneseq }
  0x4d   : > { %746 = vmatpush.bf16.msra.mxu0 %v1815_v2  ;;  %v1925_v7 = vld [vmem:[%s2712_s1] ss:$0 sm:$0xff]  ;;  %s2191_s5 = smov 88   ;;  %s2192_s11 = smov 96   ;;  %vm843_vm4 = vcmask 1043456   ;;  %vm1005_vm5 = vcmask 130112  }
  0x4e   : > { %s2193_s28 = smov 112   ;;  %s2194_s10 = smov 80   ;;  %v755_v41 = vshrl.u32 %v754_v40, 7  ;;  %v757_v42 = vand.u32 127, %v754_v40  ;;  %vm1130_vm6 = vcmask 195712   ;;  %vm1255_vm7 = vcmask 261312  }
  0x4f   : > { %s2195_s9 = smov 72   ;;  %s2196_s20 = smov 104   ;;  %vm1440_vm15 = vcmask 523264  }
  0x50   : > { %vm2494_vm3 = vcmp.gt.s32.totalorder %v757_v42, %v755_v41  ;;  %s2197_s25 = smov 64   ;;  %s2198_s0 = smov 56  }
  0x51   : > { %v2451_v4 = vld [vmem:[#allocation11] sm:$0xff]  ;;  %747 = vmatpush.bf16.msra.mxu0 %v1814_v3  ;;  %s2199_s27 = smov 48   ;;  %s2200_s17 = smov 40  }
  0x52   : > { %v2453_v5 = vld [vmem:[#allocation11 + $0x8] sm:$0xff]  ;;  %s2201_s15 = smov 8   ;;  %s2202_s23 = smov 16  }
  0x53   : > { %v715_v6 = vpack.c.bf16 %v2453_v5, %v2451_v4  ;;  %s2203_s13 = smov 24   ;;  %p1855_p3 = scmp.eq.s32.totalorder %s2342_s14, 1 }
  0x55   : > { %1754 = vmatmul.msk.bf16.vlgmr.msra.gmra.mxu0 %vm736_vm1, %v715_v6 }
  0xd2   : > { %v749_v8 = vpop.f32.mrf.mxu0 }
  0xd3   : > { %v750_v9 = vadd.f32 %v1925_v7, %v749_v8 }
  0xd5   : > { %v759_v10 = vpack.c.bf16 %v750_v9, %v750_v9 }
  0xd7   : > { %v762_v11 = vunpack.c.l.b16 %v759_v10 }
  0xd9   : > { %v2460_v12 = vpack.c.b16 %v762_v11, %v762_v11 }
  0xda   : > { %v751_v13 = vpop.f32.mrf.mxu0 }
  0xdb   : > { %v752_v14 = vadd.f32 %v1925_v7, %v751_v13  ;;  %883 = vrot.lane.b32.xlu2 %v2460_v12, %s2190_s3  ;;  %885 = vrot.lane.b32.xlu1 %v2460_v12, %s2191_s5 }
  0xdc   : > { %764 = vrot.lane.b32.xlu0 %v2460_v12, %s2192_s11 }
  0xdd   : > { %v760_v15 = vpack.c.bf16 %v752_v14, %v752_v14 }
  0xdf   : > { %v787_v16 = vunpack.c.l.b16 %v760_v15 }
  0xe1   : > { %v2465_v17 = vpack.c.b16 %v787_v16, %v787_v16 }
  0xe3   : > { %906 = vrot.lane.b32.xlu2 %v2465_v17, %s2190_s3  ;;  %908 = vrot.lane.b32.xlu1 %v2465_v17, %s2191_s5  ;;  %s2717_s5 = scalar_lea.vmem %s2672_s6, %s2408_s19 }
  0xe4   : > { %789 = vrot.lane.b32.xlu0 %v2465_v17, %s2192_s11 }
  0xeb   : > { %1008 = vrot.lane.b32.xlu2 %v2460_v12, %s2193_s28  ;;  %1033 = vrot.lane.b32.xlu1 %v2465_v17, %s2194_s10 }
  0xec   : > { %1010 = vrot.lane.b32.xlu0 %v2460_v12, %s2194_s10 }
  0xf3   : > { %1158 = vrot.lane.b32.xlu2 %v2465_v17, %s2195_s9  ;;  %1135 = vrot.lane.b32.xlu1 %v2460_v12, %s2195_s9 }
  0xf4   : > { %1031 = vrot.lane.b32.xlu0 %v2465_v17, %s2193_s28 }
  0xfb   : > { %1156 = vrot.lane.b32.xlu1 %v2465_v17, %s2196_s20 }
  0xfc   : > { %1133 = vrot.lane.b32.xlu0 %v2460_v12, %s2196_s20 }
 0x135   : > { %v884_v18 = vpop.permute.xlu2 %883 }
 0x13d   : > { %v907_v23 = vpop.permute.xlu2 %906 }
 0x145   : > { %v1009_v28 = vpop.permute.xlu2 %1008 }
 0x14d   : > { %v886_v19 = vpop.permute.xlu1 %885  ;;  %v1159_v33 = vpop.permute.xlu2 %1158 }
 0x14e   : > { %v765_v20 = vpop.permute.xlu0 %764  ;;  %v891_v21 = vsel %vm766_vm2, %v886_v19, 0  ;;  %v1164_v36 = vsel %vm766_vm2, %v1159_v33, 0 }
 0x14f   : > { %v771_v22 = vsel %vm766_vm2, %v765_v20, 0  ;;  %900 = vmatpush.bf16.xpose.msrb.mxu0 %v891_v21 }
 0x150   : > { %780 = vmatpush.bf16.xpose.msra.mxu1 %v771_v22 }
 0x155   : > { %v909_v24 = vpop.permute.xlu1 %908 }
 0x156   : > { %v790_v25 = vpop.permute.xlu0 %789  ;;  %1759 = vmatmul.msk.bf16.vlgmr.msrb.gmra.mxu0 %vm766_vm2, %v884_v18  ;;  %v914_v26 = vsel %vm766_vm2, %v909_v24, 0 }
 0x157   : > { %1755 = vmatmul.msk.bf16.vlgmr.msra.gmra.mxu1 %vm766_vm2, %v759_v10  ;;  %v795_v27 = vsel %vm766_vm2, %v790_v25, 0 }
 0x158   : > { %804 = vmatpush.bf16.xpose.msra.mxu2 %v795_v27  ;;  %923 = vmatpush.bf16.xpose.msrb.mxu1 %v914_v26 }
 0x15d   : > { %v1034_v29 = vpop.permute.xlu1 %1033 }
 0x15e   : > { %v1039_v30 = vsel %vm766_vm2, %v1034_v29, 0  ;;  %v1011_v31 = vpop.permute.xlu0 %1010 }
 0x15f   : > { %v1016_v32 = vsel %vm766_vm2, %v1011_v31, 0  ;;  %1756 = vmatmul.msk.bf16.vlgmr.msra.gmra.mxu2 %vm766_vm2, %v760_v15 }
 0x160   : > { %1048 = vmatpush.bf16.xpose.msra.mxu1 %v1039_v30  ;;  %1025 = vmatpush.bf16.xpose.msra.mxu0 %v1016_v32 }
 0x165   : > { %v1136_v34 = vpop.permute.xlu1 %1135 }
 0x166   : > { %v1141_v35 = vsel %vm766_vm2, %v1136_v34, 0  ;;  %v1032_v37 = vpop.permute.xlu0 %1031 }
 0x167   : > { %1760 = vmatmul.msk.bf16.vlgmr.msrb.gmra.mxu1 %vm766_vm2, %v907_v23  ;;  %1763 = vmatmul.msk.bf16.vlgmr.msra.gmra.mxu0 %vm766_vm2, %v1009_v28 }
 0x168   : > { %1173 = vmatpush.bf16.xpose.msrb.mxu1 %v1164_v36  ;;  %1150 = vmatpush.bf16.xpose.msrb.mxu0 %v1141_v35 }
 0x16d   : > { %v1157_v39 = vpop.permute.xlu1 %1156 }
 0x16e   : > { %v1134_v38 = vpop.permute.xlu0 %1133 }
 0x177   : > { %1764 = vmatmul.msk.bf16.vlgmr.msra.gmra.mxu1 %vm766_vm2, %v1032_v37  ;;  %1767 = vmatmul.msk.bf16.vlgmr.msrb.gmra.mxu0 %vm766_vm2, %v1134_v38 }
 0x187   : > { %1768 = vmatmul.msk.bf16.vlgmr.msrb.gmra.mxu1 %vm766_vm2, %v1157_v39 }
 0x1d3   : > { %v902_v44 = vpop.f32.mrf.mxu0 }
 0x1d4   : > { %v782_v45 = vpop.f32.mrf.mxu1  ;;  %v929_v46 = vsel %vm2494_vm3, -1e+30, %v902_v44 }
 0x1d5   : > { %v812_v47 = vsel %vm2494_vm3, -1e+30, %v782_v45  ;;  %v931_v48 = vsel %vm766_vm2, %v929_v46, -inf }
 0x1d6   : > { %932 = vmax.xlane.f32.xlu1 %v931_v48  ;;  %v814_v49 = vsel %vm766_vm2, %v812_v47, -inf }
 0x1d7   : > { %815 = vmax.xlane.f32.xlu2 %v814_v49 }
 0x1db   : > { %v904_v50 = vpop.f32.mrf.mxu0 }
 0x1dc   : > { %v784_v51 = vpop.f32.mrf.mxu1 }
 0x1e2   : > { %v806_v52 = vpop.f32.mrf.mxu2 }
 0x1e3   : > { %v813_v53 = vsel %vm2494_vm3, -1e+30, %v806_v52 }
 0x1e4   : > { %v925_v54 = vpop.f32.mrf.mxu1  ;;  %v1027_v55 = vpop.f32.mrf.mxu0  ;;  %v817_v56 = vsel %vm766_vm2, %v813_v53, -inf }
 0x1e5   : > { %v930_v57 = vsel %vm2494_vm3, -1e+30, %v925_v54  ;;  %v2511_v58 = vsel %vm2494_vm3, -1e+30, %v1027_v55  ;;  %818 = vmax.xlane.f32.xlu0 %v817_v56 }
 0x1e6   : > { %v934_v59 = vsel %vm766_vm2, %v930_v57, -inf  ;;  %v1056_v13 = vsel %vm766_vm2, %v2511_v58, -inf }
 0x1e7   : > { %935 = vmax.xlane.f32.xlu2 %v934_v59 }
 0x1ea   : > { %v808_v60 = vpop.f32.mrf.mxu2 }
 0x1ec   : > { %v927_v61 = vpop.f32.mrf.mxu1  ;;  %v1029_v62 = vpop.f32.mrf.mxu0 }
 0x1ef   : > { %860 = vrot.lane.b32.xlu1 %v2465_v17, %s2197_s25 }
 0x1f4   : > { %v1050_v63 = vpop.f32.mrf.mxu1  ;;  %v1152_v0 = vpop.f32.mrf.mxu0 }
 0x1f5   : > { %v1055_v8 = vsel %vm2494_vm3, -1e+30, %v1050_v63  ;;  %v1179_v11 = vsel %vm2494_vm3, -1e+30, %v1152_v0 }
 0x1f6   : > { %v1059_v10 = vsel %vm766_vm2, %v1055_v8, -inf  ;;  %v1181_v14 = vsel %vm766_vm2, %v1179_v11, -inf }
 0x1f7   : > { %976 = vrot.lane.b32.xlu1 %v2465_v17, %s2198_s0 }
 0x1f9   : > { %955 = vrot.lane.b32.xlu0 %v2460_v12, %s2198_s0 }
 0x1fc   : > { %v1052_v1 = vpop.f32.mrf.mxu1  ;;  %v1154_v2 = vpop.f32.mrf.mxu0 }
 0x1ff   : > { %838 = vrot.lane.b32.xlu2 %v2460_v12, %s2197_s25 }
 0x204   : > { %v1175_v3 = vpop.f32.mrf.mxu1 }
 0x205   : > { %v1180_v7 = vsel %vm2494_vm3, -1e+30, %v1175_v3 }
 0x206   : > { %v1184_v9 = vsel %vm766_vm2, %v1180_v7, -inf }
 0x20c   : > { %v1177_v6 = vpop.f32.mrf.mxu1 }
 0x221   : > { %1185 = vmax.xlane.f32.xlu1 %v1184_v9 }
 0x223   : > { %1060 = vmax.xlane.f32.xlu0 %v1059_v10 }
 0x228   : > { %1057 = vmax.xlane.f32.xlu2 %v1056_v13 }
 0x22b   : > { %1182 = vmax.xlane.f32.xlu0 %v1181_v14 }
 0x249   : > { %v933_v15 = vpop.xlane.xlu1 %932 }
 0x24a   : > { %v937_v16 = vsub.f32 %v929_v46, %v933_v15  ;;  %v816_v18 = vpop.xlane.xlu2 %815 }
 0x24b   : > { %v820_v19 = vsub.f32 %v812_v47, %v816_v18 }
 0x24c   : > { %v939_v20 = vmul.f32 1.442695, %v937_v16 }
 0x24d   : > { %v822_v21 = vmul.f32 1.442695, %v820_v19 }
 0x24e   : > { %1933 = vpow2.f32 %v939_v20 }
 0x24f   : > { %1935 = vpow2.f32 %v822_v21 }
 0x254   : > { %v2529_v22 = vpop.eup %1933 }
 0x255   : > { %v2531_v23 = vpop.eup %1935  ;;  %v943_v24 = vsel %vm766_vm2, %v2529_v22, 0.0 }
 0x256   : > { %v826_v25 = vsel %vm766_vm2, %v2531_v23, 0.0  ;;  %944 = vadd.xlane.f32.xlu0 %v943_v24 }
 0x257   : > { %827 = vadd.xlane.f32.xlu1 %v826_v25 }
 0x258   : > { %v819_v26 = vpop.xlane.xlu0 %818 }
 0x259   : > { %v821_v27 = vsub.f32 %v813_v53, %v819_v26 }
 0x25a   : > { %v936_v28 = vpop.xlane.xlu2 %935 }
 0x25b   : > { %v824_v29 = vmul.f32 1.442695, %v821_v27  ;;  %v938_v30 = vsub.f32 %v930_v57, %v936_v28 }
 0x25d   : > { %1937 = vpow2.f32 %v824_v29  ;;  %v941_v31 = vmul.f32 1.442695, %v938_v30 }
 0x25f   : > { %1939 = vpow2.f32 %v941_v31 }
 0x261   : > { %v861_v32 = vpop.permute.xlu1 %860 }
 0x262   : > { %v839_v33 = vpop.permute.xlu2 %838  ;;  %v866_v34 = vsel %vm843_vm4, %v861_v32, 0 }
 0x263   : > { %v2538_v35 = vpop.eup %1937  ;;  %v845_v36 = vsel %vm843_vm4, %v839_v33, 0 }
 0x264   : > { %854 = vmatpush.bf16.msra.mxu3 %v845_v36  ;;  %v829_v37 = vsel %vm766_vm2, %v2538_v35, 0.0 }
 0x265   : > { %v2543_v38 = vpop.eup %1939  ;;  %830 = vadd.xlane.f32.xlu0 %v829_v37 }
 0x266   : > { %v946_v39 = vsel %vm766_vm2, %v2543_v38, 0.0 }
 0x267   : > { %947 = vadd.xlane.f32.xlu2 %v946_v39 }
 0x268   : > { %875 = vmatpush.bf16.msrb.mxu3 %v866_v34 }
 0x269   : > { %v977_v42 = vpop.permute.xlu1 %976 }
 0x26a   : > { %v982_v9 = vsel %vm843_vm4, %v977_v42, 0 }
 0x26b   : > { %v956_v40 = vpop.permute.xlu0 %955 }
 0x26c   : > { %v961_v41 = vsel %vm843_vm4, %v956_v40, 0 }
 0x26d   : > { %970 = vmatpush.bf16.msrb.mxu2 %v961_v41 }
 0x270   : > { %1101 = vrot.lane.b32.xlu1 %v2465_v17, %s2199_s27 }
 0x27f   : > { %1080 = vrot.lane.b32.xlu2 %v2460_v12, %s2199_s27 }
 0x294   : > { %v1186_v43 = vpop.xlane.xlu1 %1185 }
 0x295   : > { %v1188_v44 = vsub.f32 %v1180_v7, %v1186_v43 }
 0x296   : > { %v1061_v45 = vpop.xlane.xlu0 %1060 }
 0x297   : > { %v1063_v46 = vsub.f32 %v1055_v8, %v1061_v45  ;;  %v1191_v48 = vmul.f32 1.442695, %v1188_v44 }
 0x299   : > { %v1066_v47 = vmul.f32 1.442695, %v1063_v46 }
 0x29b   : > { %1941 = vpow2.f32 %v1066_v47  ;;  %v1058_v49 = vpop.xlane.xlu2 %1057 }
 0x29c   : > { %v1062_v50 = vsub.f32 %v2511_v58, %v1058_v49  ;;  %1943 = vpow2.f32 %v1191_v48 }
 0x29e   : > { %v1064_v51 = vmul.f32 1.442695, %v1062_v50  ;;  %v1183_v52 = vpop.xlane.xlu0 %1182 }
 0x29f   : > { %v1187_v53 = vsub.f32 %v1179_v11, %v1183_v52 }
 0x2a0   : > { %1945 = vpow2.f32 %v1064_v51 }
 0x2a1   : > { %v1942_v54 = vpop.eup %1941  ;;  %v1189_v55 = vmul.f32 1.442695, %v1187_v53 }
 0x2a2   : > { %v1071_v56 = vsel %vm766_vm2, %v1942_v54, 0.0  ;;  %v2552_v57 = vpop.eup %1943 }
 0x2a3   : > { %1947 = vpow2.f32 %v1189_v55  ;;  %1072 = vadd.xlane.f32.xlu0 %v1071_v56  ;;  %v1196_v61 = vsel %vm766_vm2, %v2552_v57, 0.0 }
 0x2a6   : > { %v1946_v59 = vpop.eup %1945 }
 0x2a7   : > { %v1068_v60 = vsel %vm766_vm2, %v1946_v59, 0.0 }
 0x2a8   : > { %1069 = vadd.xlane.f32.xlu1 %v1068_v60  ;;  %1197 = vadd.xlane.f32.xlu2 %v1196_v61  ;;  %v1817_v61 = vld [vmem:[%s2421_s12 + $0x8] sm:$0xff] }
 0x2a9   : > { %v1948_v58 = vpop.eup %1947  ;;  %1290 = vmatpush.bf16.msra.mxu0 %v1817_v61 }
 0x2aa   : > { %v1193_v62 = vsel %vm766_vm2, %v1948_v58, 0.0 }
 0x2ab   : > { %1194 = vadd.xlane.f32.xlu0 %v1193_v62 }
 0x2bf   : > { %1205 = vrot.lane.b32.xlu0 %v2460_v12, %s2200_s17 }
 0x2c1   : > { %1226 = vrot.lane.b32.xlu1 %v2465_v17, %s2200_s17 }
 0x2c9   : > { %v945_v63 = vpop.xlane.xlu0 %944 }
 0x2ca   : > { %v828_v0 = vpop.xlane.xlu1 %827  ;;  %1949 = vrcp.f32 %v945_v63 }
 0x2cb   : > { %1951 = vrcp.f32 %v828_v0 }
 0x2d0   : > { %v1950_v1 = vpop.eup %1949 }
 0x2d1   : > { %v1952_v2 = vpop.eup %1951  ;;  %v951_v3 = vmul.f32 %v1950_v1, %v2529_v22 }
 0x2d2   : > { %v834_v6 = vmul.f32 %v1952_v2, %v2531_v23 }
 0x2d3   : > { %v953_v7 = vpack.c.bf16 %v951_v3, %v951_v3 }
 0x2d4   : > { %v836_v8 = vpack.c.bf16 %v834_v6, %v834_v6 }
 0x2d5   : > { %1761 = vmatmul.msk.bf16.vlgmr.msrb.gmra.mxu2 %vm766_vm2, %v953_v7 }
 0x2d6   : > { %1757 = vmatmul.msk.bf16.vlgmr.msra.gmra.mxu3 %vm766_vm2, %v836_v8 }
 0x2d7   : > { %991 = vmatpush.bf16.msra.mxu3 %v982_v9 }
 0x2d8   : > { %v831_v12 = vpop.xlane.xlu0 %830 }
 0x2d9   : > { %1953 = vrcp.f32 %v831_v12 }
 0x2da   : > { %v948_v17 = vpop.xlane.xlu2 %947 }
 0x2db   : > { %1955 = vrcp.f32 %v948_v17 }
 0x2df   : > { %v1954_v10 = vpop.eup %1953 }
 0x2e0   : > { %v835_v11 = vmul.f32 %v1954_v10, %v2538_v35 }
 0x2e1   : > { %v1956_v19 = vpop.eup %1955 }
 0x2e2   : > { %v1081_v13 = vpop.permute.xlu2 %1080  ;;  %v1102_v15 = vpop.permute.xlu1 %1101  ;;  %v837_v16 = vpack.c.bf16 %v835_v11, %v835_v11  ;;  %v952_v20 = vmul.f32 %v1956_v19, %v2543_v38 }
 0x2e3   : > { %v1086_v14 = vsel %vm843_vm4, %v1081_v13, 0  ;;  %v1107_v18 = vsel %vm843_vm4, %v1102_v15, 0  ;;  %v2204_v15 = vmov 32.0  }
 0x2e4   : > { %1095 = vmatpush.bf16.msra.mxu2 %v1086_v14  ;;  %v954_v21 = vpack.c.bf16 %v952_v20, %v952_v20 }
 0x2e6   : > { %1758 = vmatmul.msk.bf16.vlgmr.msrb.gmra.mxu3 %vm766_vm2, %v837_v16 }
 0x2e7   : > { %1116 = vmatpush.bf16.msrb.mxu3 %v1107_v18 }
 0x2f6   : > { %1762 = vmatmul.msk.bf16.vlgmr.msra.gmra.mxu3 %vm766_vm2, %v954_v21 }
 0x316   : > { %v1073_v22 = vpop.xlane.xlu0 %1072 }
 0x317   : > { %1957 = vrcp.f32 %v1073_v22 }
 0x31b   : > { %v1070_v23 = vpop.xlane.xlu1 %1069  ;;  %v1198_v29 = vpop.xlane.xlu2 %1197 }
 0x31c   : > { %1959 = vrcp.f32 %v1070_v23 }
 0x31d   : > { %v1958_v24 = vpop.eup %1957  ;;  %1961 = vrcp.f32 %v1198_v29 }
 0x31e   : > { %v1077_v25 = vmul.f32 %v1958_v24, %v1942_v54  ;;  %v1195_v31 = vpop.xlane.xlu0 %1194 }
 0x31f   : > { %1963 = vrcp.f32 %v1195_v31  ;;  %v1819_v31 = vld [vmem:[%s2430_s30 + $0x8] sm:$0xff] }
 0x320   : > { %v1079_v26 = vpack.c.bf16 %v1077_v25, %v1077_v25  ;;  %1965 = vrcp.f32 %v2204_v15  ;;  %1393 = vmatpush.bf16.msra.mxu1 %v1819_v31 }
 0x322   : > { %1766 = vmatmul.msk.bf16.vlgmr.msrb.gmra.mxu3 %vm766_vm2, %v1079_v26  ;;  %v1960_v27 = vpop.eup %1959 }
 0x323   : > { %v1076_v28 = vmul.f32 %v1960_v27, %v1946_v59  ;;  %v1962_v32 = vpop.eup %1961 }
 0x324   : > { %v1202_v35 = vmul.f32 %v1962_v32, %v2552_v57 }
 0x325   : > { %v1078_v30 = vpack.c.bf16 %v1076_v28, %v1076_v28  ;;  %v1964_v33 = vpop.eup %1963 }
 0x326   : > { %v1201_v36 = vmul.f32 %v1964_v33, %v1948_v58  ;;  %v1204_v40 = vpack.c.bf16 %v1202_v35, %v1202_v35  ;;  %v1816_v58 = vld [vmem:[%s2421_s12] sm:$0xff]  ;;  %s2715_s12 = scalar_lea.vmem %s2670_s4, %s2408_s19  ;;  %v1966_v16 = vpop.eup %1965  ;;  %s2722_s19 = sld [smem:[#allocation30_spill]] }
 0x327   : > { %1765 = vmatmul.msk.bf16.vlgmr.msra.gmra.mxu2 %vm766_vm2, %v1078_v30  ;;  %1291 = vmatpush.bf16.msra.mxu0 %v1816_v58  ;;  %v1926_v7 = vld [vmem:[%s2715_s12] ss:$0 sm:$0xff]  ;;  %v1307_v18 = vmul.f32 32.0, %v1966_v16  ;;  %vm1311_vm8 = vweird.f32 %v1966_v16 }
 0x328   : > { %v1203_v41 = vpack.c.bf16 %v1201_v36, %v1201_v36  ;;  %v1818_v35 = vld [vmem:[%s2430_s30] sm:$0xff]  ;;  %s2716_s30 = scalar_lea.vmem [#allocation8], %s2392_s2 }
 0x329   : > { %v1308_v19 = vsub.f32 1.0, %v1307_v18  ;;  %1394 = vmatpush.bf16.msra.mxu1 %v1818_v35 }
 0x32b   : > { %v1309_v20 = vmul.f32 %v1966_v16, %v1308_v19 }
 0x32d   : > { %v1310_v21 = vadd.f32 %v1966_v16, %v1309_v20 }
 0x331   : > { %v1206_v34 = vpop.permute.xlu0 %1205 }
 0x332   : > { %v1211_v37 = vsel %vm843_vm4, %v1206_v34, 0 }
 0x333   : > { %v1227_v38 = vpop.permute.xlu1 %1226  ;;  %1220 = vmatpush.bf16.msrb.mxu2 %v1211_v37 }
 0x334   : > { %v1232_v39 = vsel %vm843_vm4, %v1227_v38, 0 }
 0x335   : > { %1241 = vmatpush.bf16.msra.mxu3 %v1232_v39 }
 0x337   : > { %1769 = vmatmul.msk.bf16.vlgmr.msrb.gmra.mxu2 %vm766_vm2, %v1203_v41 }
 0x338   : > { %1770 = vmatmul.msk.bf16.vlgmr.msra.gmra.mxu3 %vm766_vm2, %v1204_v40 }
 0x358   : > { %v972_v42 = vpop.f32.mrf.mxu2 }
 0x359   : > { %v856_v43 = vpop.f32.mrf.mxu3  ;;  %999 = vrot.lane.b32.xlu0 %v972_v42, %s2201_s15 }
 0x35a   : > { %881 = vst.msk [vmem:[#allocation2] sm:$0xff] %vm766_vm2, %v856_v43 }
 0x360   : > { %v974_v44 = vpop.f32.mrf.mxu2 }
 0x361   : > { %v858_v45 = vpop.f32.mrf.mxu3 }
 0x369   : > { %v877_v46 = vpop.f32.mrf.mxu3 }
 0x36a   : > { %882 = vst.msk [vmem:[#allocation2 + $0x8] sm:$0xff] %vm766_vm2, %v877_v46 }
 0x371   : > { %v879_v47 = vpop.f32.mrf.mxu3 }
 0x379   : > { %v993_v48 = vpop.f32.mrf.mxu3 }
 0x37a   : > { %1001 = vrot.lane.b32.xlu1 %v993_v48, %s2201_s15 }
 0x381   : > { %v995_v49 = vpop.f32.mrf.mxu3 }
 0x3a5   : > { %v1118_v50 = vpop.f32.mrf.mxu3 }
 0x3a6   : > { %1126 = vrot.lane.b32.xlu1 %v1118_v50, %s2202_s23 }
 0x3aa   : > { %v1097_v51 = vpop.f32.mrf.mxu2 }
 0x3ab   : > { %1124 = vrot.lane.b32.xlu0 %v1097_v51, %s2202_s23  ;;  %v1927_v51 = vld [vmem:[%s2716_s30] ss:$0 sm:$0xff] }
 0x3ad   : > { %v1120_v52 = vpop.f32.mrf.mxu3 }
 0x3b2   : > { %v1099_v53 = vpop.f32.mrf.mxu2 }
 0x3ba   : > { %v1222_v54 = vpop.f32.mrf.mxu2 }
 0x3bb   : > { %v1243_v55 = vpop.f32.mrf.mxu3  ;;  %1249 = vrot.lane.b32.xlu2 %v1222_v54, %s2203_s13 }
 0x3bc   : > { %1251 = vrot.lane.b32.xlu0 %v1243_v55, %s2203_s13  ;;  %v1928_v55 = vld [vmem:[%s2717_s5] ss:$0 sm:$0xff]  ;;  %s2206_s13 = smov 128  }
 0x3c2   : > { %v1224_v56 = vpop.f32.mrf.mxu2 }
 0x3c3   : > { %v1245_v57 = vpop.f32.mrf.mxu3 }
 0x3cb   : > { %v1000_v59 = vpop.permute.xlu0 %999 }
 0x3cc   : > { %1006 = vst.msk [vmem:[#allocation2] sm:$0xff] %vm1005_vm5, %v1000_v59 }
 0x3ec   : > { %v1002_v60 = vpop.permute.xlu1 %1001 }
 0x3ed   : > { %1007 = vst.msk [vmem:[#allocation2 + $0x8] sm:$0xff] %vm1005_vm5, %v1002_v60 }
 0x415   : > { %v1250_v0 = vpop.permute.xlu2 %1249 }
 0x418   : > { %v1127_v62 = vpop.permute.xlu1 %1126 }
 0x419   : > { %1132 = vst.msk [vmem:[#allocation2 + $0x8] sm:$0xff] %vm1130_vm6, %v1127_v62  ;;  %v1823_v62 = vld [vmem:[%s2440_s16 + $0x18] sm:$0xff] }
 0x41a   : > { %1448 = vmatpush.bf16.msra.mxu2 %v1823_v62 }
 0x41d   : > { %v1125_v63 = vpop.permute.xlu0 %1124 }
 0x41e   : > { %1131 = vst.msk [vmem:[#allocation2] sm:$0xff] %vm1130_vm6, %v1125_v63  ;;  %v1822_v63 = vld [vmem:[%s2440_s16 + $0x10] sm:$0xff] }
 0x41f   : > { %1256 = vst.msk [vmem:[#allocation2] sm:$0xff] %vm1255_vm7, %v1250_v0  ;;  %1449 = vmatpush.bf16.msra.mxu2 %v1822_v63  ;;  %v1821_v0 = vld [vmem:[%s2440_s16 + $0x8] sm:$0xff] }
 0x423   : > { %1450 = vmatpush.bf16.msra.mxu2 %v1821_v0 }
 0x426   : > { %v1258_v2 = vld [vmem:[#allocation2] sm:$0xff] }
 0x42e   : > { %v1252_v1 = vpop.permute.xlu0 %1251 }
 0x42f   : > { %1257 = vst.msk [vmem:[#allocation2 + $0x8] sm:$0xff] %vm1255_vm7, %v1252_v1  ;;  %v1820_v1 = vld [vmem:[%s2440_s16] sm:$0xff] }
 0x430   : > { %1451 = vmatpush.bf16.msra.mxu2 %v1820_v1 }
 0x436   : > { %v1259_v3 = vld [vmem:[#allocation2 + $0x8] sm:$0xff] }
 0x437   : > { %v1260_v6 = vpack.c.bf16 %v1259_v3, %v1258_v2  ;;  %v1929_v3 = vld [vmem:[%s690_s22] ss:$0 sm:$0xff]  ;;  %s2720_s22 = scalar_lea.vmem [#allocation9], %s2392_s2  ;;  %s2205_s2 = smov [#allocation11]  }
 0x438   : > { %s1526_s27 = sshll.u32 %s2205_s2, 4  ;;  %s1527_s27 = int_to_ptr.vmem [resolvable:$true] %s1526_s27 }
 0x439   : > { %1779 = vmatmul.msk.bf16.vlgmr.msra.gmra.mxu0 %vm736_vm1, %v1260_v6 }
 0x4b6   : > { %v1293_v8 = vpop.f32.mrf.mxu0 }
 0x4b7   : > { %v1294_v9 = vadd.f32 %v1926_v7, %v1293_v8 }
 0x4b9   : > { %v1298_v12 = vadd.f32 %v1294_v9, %v2451_v4  ;;  %v2594_v4 = vsel %vm1311_vm8, %v1966_v16, %v1310_v21 }
 0x4bb   : > { %v1300_v17 = vsel %vm736_vm1, %v1298_v12, 0.0 }
 0x4bc   : > { %1301 = vadd.xlane.f32.xlu1 %v1300_v17 }
 0x4be   : > { %v1295_v10 = vpop.f32.mrf.mxu0 }
 0x4bf   : > { %v1296_v11 = vadd.f32 %v1926_v7, %v1295_v10  ;;  %v1930_v10 = vld [vmem:[%s698_s18] ss:$0 sm:$0xff] }
 0x4c1   : > { %v1299_v13 = vadd.f32 %v1296_v11, %v2453_v5 }
 0x4c3   : > { %v1303_v14 = vsel %vm736_vm1, %v1299_v13, 0.0 }
 0x4c4   : > { %1304 = vadd.xlane.f32.xlu0 %v1303_v14 }
 0x52f   : > { %v1302_v22 = vpop.xlane.xlu1 %1301 }
 0x530   : > { %v1313_v23 = vmul.f32 %v2594_v4, %v1302_v22 }
 0x532   : > { %v1315_v24 = vsub.f32 %v1298_v12, %v1313_v23 }
 0x534   : > { %v1317_v5 = vmul.f32 %v1315_v24, %v1315_v24 }
 0x536   : > { %v1319_v25 = vsel %vm736_vm1, %v1317_v5, 0.0 }
 0x537   : > { %v1305_v26 = vpop.xlane.xlu0 %1304  ;;  %1320 = vadd.xlane.f32.xlu2 %v1319_v25 }
 0x538   : > { %v1314_v27 = vmul.f32 %v2594_v4, %v1305_v26 }
 0x53a   : > { %v1316_v28 = vsub.f32 %v1299_v13, %v1314_v27 }
 0x53c   : > { %v1318_v29 = vmul.f32 %v1316_v28, %v1316_v28 }
 0x53e   : > { %v1322_v30 = vsel %vm736_vm1, %v1318_v29, 0.0 }
 0x53f   : > { %1323 = vadd.xlane.f32.xlu1 %v1322_v30 }
 0x5aa   : > { %v1321_v32 = vpop.xlane.xlu2 %1320 }
 0x5ab   : > { %v1325_v33 = vmul.f32 %v1321_v32, %v2594_v4 }
 0x5ad   : > { %v1327_v34 = vadd.f32 1e-05, %v1325_v33 }
 0x5af   : > { %1967 = vrsqrt.f32 %v1327_v34  ;;  %vm1335_vm10 = vweird.f32 %v1327_v34 }
 0x5b2   : > { %v1324_v36 = vpop.xlane.xlu1 %1323 }
 0x5b3   : > { %v1326_v37 = vmul.f32 %v1324_v36, %v2594_v4 }
 0x5b5   : > { %v1968_v38 = vpop.eup %1967  ;;  %v1328_v39 = vadd.f32 1e-05, %v1326_v37 }
 0x5b6   : > { %v1330_v40 = vmul.f32 %v1968_v38, %v1327_v34  ;;  %vm1336_vm9 = vweird.f32 %v1968_v38 }
 0x5b7   : > { %1969 = vrsqrt.f32 %v1328_v39  ;;  %vm1337_vm11 = vmor %vm1335_vm10, %vm1336_vm9  ;;  %vm1345_vm13 = vweird.f32 %v1328_v39 }
 0x5b8   : > { %v1331_v41 = vmul.f32 %v1968_v38, %v1330_v40 }
 0x5ba   : > { %v1332_v42 = vmul.f32 0.5, %v1331_v41 }
 0x5bc   : > { %v1333_v43 = vsub.f32 1.5, %v1332_v42 }
 0x5bd   : > { %v1970_v44 = vpop.eup %1969 }
 0x5be   : > { %v1334_v45 = vmul.f32 %v1968_v38, %v1333_v43  ;;  %v1340_v46 = vmul.f32 %v1970_v44, %v1328_v39  ;;  %vm1346_vm12 = vweird.f32 %v1970_v44 }
 0x5bf   : > { %vm1347_vm14 = vmor %vm1345_vm13, %vm1346_vm12 }
 0x5c0   : > { %v1341_v47 = vmul.f32 %v1970_v44, %v1340_v46  ;;  %v1338_v48 = vsel %vm1337_vm11, %v1968_v38, %v1334_v45 }
 0x5c1   : > { %v1349_v52 = vmul.f32 %v1338_v48, %v1315_v24 }
 0x5c2   : > { %v1342_v49 = vmul.f32 0.5, %v1341_v47 }
 0x5c3   : > { %v1355_v56 = vmul.f32 %v1927_v51, %v1349_v52 }
 0x5c4   : > { %v1343_v50 = vsub.f32 1.5, %v1342_v49 }
 0x5c5   : > { %v1361_v60 = vadd.f32 %v1928_v55, %v1355_v56 }
 0x5c6   : > { %v1344_v53 = vmul.f32 %v1970_v44, %v1343_v50 }
 0x5c8   : > { %v1348_v54 = vsel %vm1347_vm14, %v1970_v44, %v1344_v53  ;;  %v1931_v44 = vld [vmem:[%s2720_s22] ss:$0 sm:$0xff] }
 0x5c9   : > { %v1350_v57 = vmul.f32 %v1348_v54, %v1316_v28 }
 0x5cb   : > { %v1356_v59 = vmul.f32 %v1927_v51, %v1350_v57 }
 0x5cd   : > { %v1362_v61 = vadd.f32 %v1928_v55, %v1356_v59 }
 0x5cf   : > { %v1363_v58 = vpack.c.bf16 %v1362_v61, %v1361_v60 }
 0x5d1   : > { %1788 = vmatmul.msk.bf16.vlgmr.msra.gmra.mxu1 %vm736_vm1, %v1363_v58 }
 0x64e   : > { %v1396_v2 = vpop.f32.mrf.mxu1 }
 0x64f   : > { %v1397_v6 = vadd.f32 %v1929_v3, %v1396_v2 }
 0x651   : > { %v1401_v9 = vmax.f32 %v1397_v6, 0.0 }
 0x656   : > { %v1398_v7 = vpop.f32.mrf.mxu1 }
 0x657   : > { %v1399_v8 = vadd.f32 %v1929_v3, %v1398_v7 }
 0x659   : > { %v1402_v12 = vmax.f32 %v1399_v8, 0.0 }
 0x65b   : > { %v1403_v17 = vpack.c.bf16 %v1402_v12, %v1401_v9 }
 0x65d   : > { %1805 = vmatmul.msk.bf16.vlgmr.msra.gmra.mxu2 %vm1440_vm15, %v1403_v17 }
 0x6e0   : > { %v1453_v11 = vpop.f32.mrf.mxu2 }
 0x6e1   : > { %v1454_v13 = vadd.f32 %v1930_v10, %v1453_v11 }
 0x6e3   : > { %v1458_v14 = vadd.f32 %v1454_v13, %v1361_v60 }
 0x6e5   : > { %v1460_v15 = vsel %vm736_vm1, %v1458_v14, 0.0 }
 0x6e6   : > { %1461 = vadd.xlane.f32.xlu0 %v1460_v15 }
 0x6e8   : > { %v1455_v16 = vpop.f32.mrf.mxu2 }
 0x6e9   : > { %v1456_v18 = vadd.f32 %v1930_v10, %v1455_v16 }
 0x6eb   : > { %v1459_v19 = vadd.f32 %v1456_v18, %v1362_v61 }
 0x6ed   : > { %v1463_v20 = vsel %vm736_vm1, %v1459_v19, 0.0 }
 0x6ee   : > { %1464 = vadd.xlane.f32.xlu1 %v1463_v20 }
 0x759   : > { %v1462_v21 = vpop.xlane.xlu0 %1461 }
 0x75a   : > { %v1466_v22 = vmul.f32 %v1462_v21, %v2594_v4 }
 0x75c   : > { %v1468_v23 = vsub.f32 %v1458_v14, %v1466_v22 }
 0x75e   : > { %v1470_v24 = vmul.f32 %v1468_v23, %v1468_v23 }
 0x760   : > { %v1472_v5 = vsel %vm736_vm1, %v1470_v24, 0.0 }
 0x761   : > { %v1465_v25 = vpop.xlane.xlu1 %1464  ;;  %1473 = vadd.xlane.f32.xlu0 %v1472_v5 }
 0x762   : > { %v1467_v26 = vmul.f32 %v1465_v25, %v2594_v4 }
 0x764   : > { %v1469_v27 = vsub.f32 %v1459_v19, %v1467_v26 }
 0x766   : > { %v1471_v28 = vmul.f32 %v1469_v27, %v1469_v27 }
 0x768   : > { %v1475_v29 = vsel %vm736_vm1, %v1471_v28, 0.0 }
 0x769   : > { %1476 = vadd.xlane.f32.xlu1 %v1475_v29 }
 0x7d4   : > { %v1474_v30 = vpop.xlane.xlu0 %1473 }
 0x7d5   : > { %v1478_v31 = vmul.f32 %v1474_v30, %v2594_v4 }
 0x7d7   : > { %v1480_v32 = vadd.f32 1e-05, %v1478_v31 }
 0x7d9   : > { %1971 = vrsqrt.f32 %v1480_v32  ;;  %vm1488_vm2 = vweird.f32 %v1480_v32 }
 0x7dc   : > { %v1477_v33 = vpop.xlane.xlu1 %1476 }
 0x7dd   : > { %v1479_v34 = vmul.f32 %v1477_v33, %v2594_v4  ;;  %v1932_v4 = vld [vmem:[%s701_s8] ss:$0 sm:$0xff]  ;;  %s1528_s8 = sshll.u32 %s2722_s19, 4  ;;  %s1529_s8 = int_to_ptr.hbm [resolvable:$true] %s1528_s8 }
 0x7df   : > { %v1972_v35 = vpop.eup %1971  ;;  %v1481_v36 = vadd.f32 1e-05, %v1479_v34 }
 0x7e0   : > { %v1483_v37 = vmul.f32 %v1972_v35, %v1480_v32  ;;  %vm1489_vm0 = vweird.f32 %v1972_v35 }
 0x7e1   : > { %1973 = vrsqrt.f32 %v1481_v36  ;;  %vm1490_vm3 = vmor %vm1488_vm2, %vm1489_vm0  ;;  %vm1498_vm5 = vweird.f32 %v1481_v36 }
 0x7e2   : > { %v1484_v38 = vmul.f32 %v1972_v35, %v1483_v37 }
 0x7e4   : > { %v1485_v39 = vmul.f32 0.5, %v1484_v38 }
 0x7e6   : > { %v1486_v40 = vsub.f32 1.5, %v1485_v39 }
 0x7e7   : > { %v1974_v41 = vpop.eup %1973 }
 0x7e8   : > { %v1487_v42 = vmul.f32 %v1972_v35, %v1486_v40  ;;  %v1493_v43 = vmul.f32 %v1974_v41, %v1481_v36  ;;  %vm1499_vm4 = vweird.f32 %v1974_v41 }
 0x7e9   : > { %vm1500_vm6 = vmor %vm1498_vm5, %vm1499_vm4 }
 0x7ea   : > { %v1491_v45 = vsel %vm1490_vm3, %v1972_v35, %v1487_v42  ;;  %v1494_v46 = vmul.f32 %v1974_v41, %v1493_v43 }
 0x7eb   : > { %v1502_v47 = vmul.f32 %v1491_v45, %v1468_v23 }
 0x7ec   : > { %v1495_v48 = vmul.f32 0.5, %v1494_v46 }
 0x7ed   : > { %v1508_v49 = vmul.f32 %v1931_v44, %v1502_v47 }
 0x7ee   : > { %v1496_v50 = vsub.f32 1.5, %v1495_v48 }
 0x7ef   : > { %v1514_v51 = vadd.f32 %v1932_v4, %v1508_v49 }
 0x7f0   : > { %v1497_v52 = vmul.f32 %v1974_v41, %v1496_v50 }
 0x7f1   : > { %1516 = vst.msk [vmem:[#allocation11] sm:$0xff] %vm736_vm1, %v1514_v51 }
 0x7f2   : > { %v1501_v53 = vsel %vm1500_vm6, %v1974_v41, %v1497_v52 }
 0x7f3   : > { %v1503_v54 = vmul.f32 %v1501_v53, %v1469_v27 }
 0x7f5   : > { %v1509_v55 = vmul.f32 %v1931_v44, %v1503_v54 }
 0x7f7   : > { %v1515_v56 = vadd.f32 %v1932_v4, %v1509_v55 }
 0x7f9   : > { %1517 = vst.msk [vmem:[#allocation11 + $0x8] sm:$0xff] %vm736_vm1, %v1515_v56 }
 0x7fa   : > { %1835 = dma.vmem_to_hbm [thread:$0]  (%p1855_p3), %s1527_s27, 256, %s1529_s8, [#allocation5], %s2206_s13, %s2206_s13, %s2201_s15  }
 0x7fb   : > { %2160 = dma.done.wait (%p1855_p3), [#allocation5], 256  }
 0x7fc   : > { %2162 = vsyncadd (%p1855_p3), [#allocation5], 4294967040 }
 0x7fd PF: > { %s2723_s21 = sld [smem:[#allocation17_spill]]  ;;  %s2727_s25 = smov %s2169_s26 }
 0x7fe   : > { %s2724_s24 = sld [smem:[#allocation16_spill]]  ;;  %s2729_s28 = smov %s2181_s29 }
 0x7ff   : > { %s2725_s27 = sld [smem:[#allocation19_spill]] }
 0x800   : > { %s2726_s12 = sld [smem:[#allocation18_spill]] }
 0x803   : > { %s31_s30 = sadd.s32 1, %s2723_s21  }
 0x804   : > { %p28_p4 = scmp.ge.s32.totalorder %s31_s30, 4   ;;  %s2728_s26 = smov %s2724_s24 }
 0x806   : > { %s2730_s29 = smov %s2726_s12  ;;  %30 = sbr.rel (!%p28_p4) target bundleno = 20 (0x14), region = 171 }
 0x80b   :  { %1545 = vsyncpa [#allocation4], 1 }
 0x80c   :  { %1547 = vsyncpa [#allocation4 + $0x1], 1 }
 0x80d   :  { %1548 = vsyncpa [#allocation7], 1 }
 0x80e   :  { %1550 = vsyncpa [#allocation7 + $0x1], 1 }
 0x80f   :  { %1551 = vsyncpa [#allocation10], 1 }
 0x810   :  { %1553 = vsyncpa [#allocation10 + $0x1], 1 }
 0x811   :  { %1554 = vsyncpa [#allocation5], 1 }
 0x812   :  { %1556 = vsyncpa [#allocation5 + $0x1], 1 }

</bundles_post_ra>
